<compile_context>
chip_gen: v5e
topology: v5e:2x2
jax: 0.10.0
libtpu: 0.0.40
codegen_flags: <defaults>
</compile_context>

<pallas_src>
import math
import functools

import numpy as np
import jax
import jax.numpy as jnp
from jax.experimental import pallas as pl
from jax.experimental.pallas import tpu as pltpu


# ----------------------------------------------------------------------------
# helpers
# ----------------------------------------------------------------------------
def _largest_aligned_divisor(dim, target, align):
    """Largest d <= target with d % align == 0 and dim % d == 0; else dim."""
    if dim <= target:
        return dim
    start = (target // align) * align
    for d in range(start, align - 1, -align):
        if dim % d == 0:
            return d
    return dim  # no aligned divisor -> full extent (required by block rules)


def _vmem_limit(estimate_bytes):
    """Scoped-VMEM request: >= 32 MiB (safe on v5e/v6e/v7x), <= 64 MiB."""
    return int(min(max(int(estimate_bytes * 1.5) + (2 << 20), 32 << 20), 64 << 20))


def _heads_per_block(d_k, h):
    """Smallest head group whose lane width is a multiple of 128."""
    if d_k % 128 == 0:
        return 1
    hpb = 128 // math.gcd(d_k, 128)
    return hpb if h % hpb == 0 else h


# ----------------------------------------------------------------------------
# Kernel 1: tiled dense / linear layer  y = x @ W_T + b
#   (W_T is the torch Linear weight already transposed to (in, out))
# ----------------------------------------------------------------------------
def _linear_kernel(x_ref, w_ref, b_ref, o_ref, acc_ref):
    @pl.when(pl.program_id(2) == 0)
    def _init():
        acc_ref[...] = jnp.zeros_like(acc_ref)

    acc_ref[...] += jnp.dot(x_ref[...], w_ref[...],
                            preferred_element_type=jnp.float32)

    @pl.when(pl.program_id(2) == pl.num_programs(2) - 1)
    def _finalize():
        o_ref[...] = (acc_ref[...] + b_ref[...]).astype(o_ref.dtype)


def linear(x2d, w_t, b, *, out_dtype=None, tm=512, tn=512, tk=512):
    """y = x2d @ w_t + b, tiled & pipelined. w_t is (in, out); b stays f32."""
    M, Din = x2d.shape
    Dout = w_t.shape[1]
    out_dtype = out_dtype or x2d.dtype
    xi, wi = x2d.dtype.itemsize, w_t.dtype.itemsize
    oi = jnp.dtype(out_dtype).itemsize
    m_align = 16 if xi == 2 else 8
    TM = _largest_aligned_divisor(M, tm, m_align)
    TN = _largest_aligned_divisor(Dout, tn, 128)
    TK = _largest_aligned_divisor(Din, tk, 128)

    vmem_est = 2 * (TM * TK * xi + TK * TN * wi + TN * 4 + TM * TN * oi) + TM * TN * 4
    cost = pl.CostEstimate(
        flops=2 * M * Dout * Din,
        transcendentals=0,
        bytes_accessed=M * Din * xi + Din * Dout * wi + Dout * 4 + M * Dout * oi)

    return pl.pallas_call(
        _linear_kernel,
        out_shape=jax.ShapeDtypeStruct((M, Dout), out_dtype),
        grid=(M // TM, Dout // TN, Din // TK),
        in_specs=[
            pl.BlockSpec((TM, TK), lambda i, j, k: (i, k)),
            pl.BlockSpec((TK, TN), lambda i, j, k: (k, j)),
            pl.BlockSpec((1, TN), lambda i, j, k: (0, j)),
        ],
        out_specs=pl.BlockSpec((TM, TN), lambda i, j, k: (i, j)),
        scratch_shapes=[pltpu.VMEM((TM, TN), jnp.float32)],
        compiler_params=pltpu.CompilerParams(
            dimension_semantics=("parallel", "parallel", "arbitrary"),
            vmem_limit_bytes=_vmem_limit(vmem_est)),
        cost_estimate=cost,
    )(x2d, w_t, b.reshape(1, Dout).astype(jnp.float32))


# ----------------------------------------------------------------------------
# Kernel 2: scaled dot-product attention fused with the output projection W_o.
# Grid = (batch, q_tiles, head_pairs).  Q/K/V blocks are 128-lane head-pair
# windows picked out of a fused (B, L, 3D) buffer (or standalone buffers) via
# column-block offsets; ctx @ W_o accumulates into a resident f32 VMEM tile
# over the head_pair (reduction) axis, so ctx never touches HBM.
# ----------------------------------------------------------------------------
def _attn_wo_kernel(q_ref, k_ref, v_ref, wo_ref, bo_ref, o_ref, acc_ref, *,
                    heads_per_block, d_k, approx_recip):
    # TODO(synk): optional mask (masked_fill with -1e9) not wired in; the
    # wrapper only supports mask=None (same as calling forward without mask).
    # TODO(synk): K/V are read full-length per step; a KV-tiled online-softmax
    # (flash) axis is needed for very long sequences (esp. v7x 64 MiB VMEM).
    hp = pl.program_id(2)

    @pl.when(hp == 0)
    def _init():
        acc_ref[...] = jnp.zeros_like(acc_ref)

    # 1/sqrt(d_k) is already folded into Wq/bq (prepare_params).
    q = q_ref[0]          # (TQ,  heads_per_block*d_k)
    k = k_ref[0]          # (Lkv, heads_per_block*d_k)
    v = v_ref[0]

    ctx = []
    for j in range(heads_per_block):          # tiny static unroll (usually 2)
        lo = j * d_k
        qh, kh, vh = q[:, lo:lo + d_k], k[:, lo:lo + d_k], v[:, lo:lo + d_k]
        # Contract on the shared d_k axis directly (no materialized k.T).
        s = jax.lax.dot_general(qh, kh, (((1,), (1,)), ((), ())),
                                preferred_element_type=jnp.float32)   # (TQ, Lkv)
        m = jnp.max(s, axis=-1, keepdims=True)
        p = jnp.exp(s - m)
        inv = pl.reciprocal(jnp.sum(p, axis=-1, keepdims=True),
                            approx=approx_recip)
        p = (p * inv).astype(vh.dtype)                    # native-dtype MXU input
        ctx.append(jnp.dot(p, vh, preferred_element_type=jnp.float32))
    ctx = jnp.concatenate(ctx, axis=-1) if heads_per_block > 1 else ctx[0]

    # Fused output projection: accumulate this head-pair's W_o contribution.
    acc_ref[...] += jnp.dot(ctx.astype(wo_ref.dtype), wo_ref[...],
                            preferred_element_type=jnp.float32)

    @pl.when(hp == pl.num_programs(2) - 1)
    def _finalize():
        o_ref[0] = (acc_ref[...] + bo_ref[...]).astype(o_ref.dtype)


def attention_output(q_arr, k_arr, v_arr, wo, bo2d, *, bases, batch, len_q,
                     len_kv, d_model, h, out_dtype, approx_recip, tq=512):
    d_k = d_model // h
    hpb = _heads_per_block(d_k, h)
    hpd = hpb * d_k
    assert hpd % 128 == 0, "TODO(synk): pad d_model to a 128-lane multiple"
    n_pairs = h // hpb
    qb, kb, vb = bases

    q_it = q_arr.dtype.itemsize
    w_it = wo.dtype.itemsize
    o_it = jnp.dtype(out_dtype).itemsize
    TQ = _largest_aligned_divisor(len_q, tq, 16 if q_it == 2 else 8)

    vmem_est = (2 * ((TQ + 2 * len_kv) * hpd * q_it + hpd * d_model * w_it
                     + d_model * 4 + TQ * d_model * o_it)
                + TQ * d_model * 4 + 2 * TQ * len_kv * 4)
    cost = pl.CostEstimate(
        flops=4 * batch * h * len_q * len_kv * d_k
              + 2 * batch * len_q * d_model * d_model,
        transcendentals=batch * h * len_q * len_kv,
        bytes_accessed=batch * (len_q + 2 * len_kv) * d_model * q_it
                       + batch * (len_q // TQ) * d_model * d_model * w_it
                       + batch * len_q * d_model * o_it)

    kern = functools.partial(_attn_wo_kernel, heads_per_block=hpb, d_k=d_k,
                             approx_recip=approx_recip)
    return pl.pallas_call(
        kern,
        out_shape=jax.ShapeDtypeStruct((batch, len_q, d_model), out_dtype),
        grid=(batch, len_q // TQ, n_pairs),
        in_specs=[
            pl.BlockSpec((1, TQ, hpd), lambda b, qt, hp: (b, qt, qb + hp)),
            pl.BlockSpec((1, len_kv, hpd), lambda b, qt, hp: (b, 0, kb + hp)),
            pl.BlockSpec((1, len_kv, hpd), lambda b, qt, hp: (b, 0, vb + hp)),
            pl.BlockSpec((hpd, d_model), lambda b, qt, hp: (hp, 0)),
            pl.BlockSpec((1, d_model), lambda b, qt, hp: (0, 0)),
        ],
        out_specs=pl.BlockSpec((1, TQ, d_model), lambda b, qt, hp: (b, qt, 0)),
        scratch_shapes=[pltpu.VMEM((TQ, d_model), jnp.float32)],
        compiler_params=pltpu.CompilerParams(
            dimension_semantics=("parallel", "parallel", "arbitrary"),
            vmem_limit_bytes=_vmem_limit(vmem_est)),
        cost_estimate=cost,
    )(q_arr, k_arr, v_arr, wo, bo2d)


# ----------------------------------------------------------------------------
# One-time parameter transform: fold 1/sqrt(d_k) into Wq/bq, build fused
# QKV / KV weights, cast MXU weights to mxu_dtype (biases stay f32).
# ----------------------------------------------------------------------------
def prepare_params(params, *, h, mxu_dtype=None):
    d_model = params["wq"].shape[0]
    d_k = d_model // h
    scale = 1.0 / math.sqrt(d_k)
    wdt = jnp.dtype(mxu_dtype) if mxu_dtype is not None else params["wq"].dtype
    f32 = jnp.float32

    wq, bq = params["wq"] * scale, params["bq"] * scale
    wk, bk = params["wk"], params["bk"]
    wv, bv = params["wv"], params["bv"]
    return {
        "wq": wq.astype(wdt), "bq": bq.astype(f32),
        "wk": wk.astype(wdt), "bk": bk.astype(f32),
        "wv": wv.astype(wdt), "bv": bv.astype(f32),
        "wqkv": jnp.concatenate([wq, wk, wv], axis=1).astype(wdt),
        "bqkv": jnp.concatenate([bq, bk, bv]).astype(f32),
        "wkv": jnp.concatenate([wk, wv], axis=1).astype(wdt),
        "bkv": jnp.concatenate([bk, bv]).astype(f32),
        "wo": params["wo"].astype(wdt),
        "bo": params["bo"].reshape(1, d_model).astype(f32),
    }


# ----------------------------------------------------------------------------
# MultiHeadAttention forward (projection=True path)
# ----------------------------------------------------------------------------
def multi_head_attention(prep, query, key, value, mask=None, *, h):
    assert mask is None  # see TODO(synk) in _attn_wo_kernel
    B, Lq, D = query.shape
    Lk = key.shape[1]
    out_dtype = query.dtype
    cdt = prep["wo"].dtype                       # MXU compute dtype
    approx = jnp.dtype(cdt) != jnp.dtype(jnp.float32)
    hpd = _heads_per_block(D // h, h) * (D // h)

    if (query is key) and (key is value):
        # Self-attention fast path: one fused (M, D) @ (D, 3D) projection GEMM.
        qkv = linear(query.reshape(B * Lq, D).astype(cdt),
                     prep["wqkv"], prep["bqkv"], out_dtype=cdt).reshape(B, Lq, 3 * D)
        q_arr = k_arr = v_arr = qkv
        bases = (0, D // hpd, 2 * D // hpd)
        Lkv = Lq
    else:
        q_arr = linear(query.reshape(B * Lq, D).astype(cdt),
                       prep["wq"], prep["bq"], out_dtype=cdt).reshape(B, Lq, D)
        if key is value:
            # Fused (D, 2D) K/V projection when key is value.
            kv_buf = linear(key.reshape(B * Lk, D).astype(cdt),
                            prep["wkv"], prep["bkv"], out_dtype=cdt).reshape(B, Lk, 2 * D)
            k_arr = v_arr = kv_buf
            bases = (0, 0, D // hpd)
        else:
            k_arr = linear(key.reshape(B * Lk, D).astype(cdt),
                           prep["wk"], prep["bk"], out_dtype=cdt).reshape(B, Lk, D)
            v_arr = linear(value.reshape(B * Lk, D).astype(cdt),
                           prep["wv"], prep["bv"], out_dtype=cdt).reshape(B, Lk, D)
            bases = (0, 0, 0)
        Lkv = Lk

    # Attention + W_o fused; returns (B, Lq, D) in the caller's dtype.
    return attention_output(q_arr, k_arr, v_arr, prep["wo"], prep["bo"],
                            bases=bases, batch=B, len_q=Lq, len_kv=Lkv,
                            d_model=D, h=h, out_dtype=out_dtype,
                            approx_recip=approx)


# ----------------------------------------------------------------------------
# Pure-JAX reference (mirrors the PyTorch forward, eval mode / no mask)
# ----------------------------------------------------------------------------
def reference_mha(params, query, key, value, *, h):
    B, Lq, D = query.shape
    d_k = D // h

    def lin(x, w_t, b):
        return x @ w_t + b

    def split_heads(x):
        return x.reshape(B, -1, h, d_k).transpose(0, 2, 1, 3)

    q = split_heads(lin(query, params["wq"], params["bq"]))
    k = split_heads(lin(key, params["wk"], params["bk"]))
    v = split_heads(lin(value, params["wv"], params["bv"]))

    scores = jnp.einsum("bhqd,bhkd->bhqk", q, k) / math.sqrt(d_k)
    p = jax.nn.softmax(scores, axis=-1)
    ctx = jnp.einsum("bhqk,bhkd->bhqd", p, v)
    ctx = ctx.transpose(0, 2, 1, 3).reshape(B, Lq, D)
    return lin(ctx, params["wo"], params["bo"])


def init_params(key, d_model):
    ks = jax.random.split(key, 8)
    bound = 1.0 / math.sqrt(d_model)

    def w(k):  # stored pre-transposed: (in, out)
        return jax.random.uniform(k, (d_model, d_model), jnp.float32, -bound, bound)

    def b(k):
        return jax.random.uniform(k, (d_model,), jnp.float32, -bound, bound)

    return {
        "wq": w(ks[0]), "bq": b(ks[1]),
        "wk": w(ks[2]), "bk": b(ks[3]),
        "wv": w(ks[4]), "bv": b(ks[5]),
        "wo": w(ks[6]), "bo": b(ks[7]),
    }


if __name__ == "__main__":
    B, L, D, H = 2, 16, 512, 8   # d_k = 64 -> 128-lane head pairs, 4 per batch

    root = jax.random.PRNGKey(0)
    kx, kq, kk, kv, kp = jax.random.split(root, 5)
    params = init_params(kp, D)

    x = jax.random.normal(kx, (B, L, D), jnp.float32)
    q_in = jax.random.normal(kq, (B, L, D), jnp.float32)
    k_in = jax.random.normal(kk, (B, L, D), jnp.float32)
    v_in = jax.random.normal(kv, (B, L, D), jnp.float32)

    # --- f32 MXU path: tight reference checks -------------------------------
    prep_f32 = prepare_params(params, h=H, mxu_dtype=None)

    out_self = jax.block_until_ready(
        multi_head_attention(prep_f32, x, x, x, mask=None, h=H))
    ref_self = reference_mha(params, x, x, x, h=H)
    np.testing.assert_allclose(np.asarray(out_self), np.asarray(ref_self),
                               rtol=2e-4, atol=2e-4)

    out_cross = jax.block_until_ready(
        multi_head_attention(prep_f32, q_in, k_in, v_in, mask=None, h=H))
    ref_cross = reference_mha(params, q_in, k_in, v_in, h=H)
    np.testing.assert_allclose(np.asarray(out_cross), np.asarray(ref_cross),
                               rtol=2e-4, atol=2e-4)

    out_kv = jax.block_until_ready(
        multi_head_attention(prep_f32, q_in, k_in, k_in, mask=None, h=H))
    ref_kv = reference_mha(params, q_in, k_in, k_in, h=H)
    np.testing.assert_allclose(np.asarray(out_kv), np.asarray(ref_kv),
                               rtol=2e-4, atol=2e-4)

    # --- bf16 MXU path (production config): loose check vs f32 reference ----
    prep_bf16 = prepare_params(params, h=H, mxu_dtype=jnp.bfloat16)
    out_self_bf16 = jax.block_until_ready(
        multi_head_attention(prep_bf16, x, x, x, mask=None, h=H))
    np.testing.assert_allclose(np.asarray(out_self_bf16), np.asarray(ref_self),
                               rtol=3e-2, atol=3e-2)

    print("KERNEL_OK")
</pallas_src>

<mosaic_0001>
module attributes {stable_mosaic.version = 11 : i64} {
  func.func @_linear_kernel(%arg0: i32, %arg1: i32, %arg2: i32, %arg3: memref<32x512xf32, #tpu.memory_space<vmem>>, %arg4: memref<512x512xf32, #tpu.memory_space<vmem>>, %arg5: memref<1x512xf32, #tpu.memory_space<vmem>>, %arg6: memref<32x512xf32, #tpu.memory_space<vmem>>, %arg7: memref<32x512xf32, #tpu.memory_space<vmem>>) attributes {dimension_semantics = [#tpu.dimension_semantics<parallel>, #tpu.dimension_semantics<parallel>, #tpu.dimension_semantics<arbitrary>], iteration_bounds = array<i64: 1, 3, 1>, scalar_prefetch = 0 : i64, scratch_operands = 1 : i64, tpu.core_type = #tpu.core_type<tc>, window_params = [{transform_indices = @transform_0, window_bounds = array<i64: 32, 512>}, {transform_indices = @transform_1, window_bounds = array<i64: 512, 512>}, {transform_indices = @transform_2, window_bounds = array<i64: 1, 512>}, {transform_indices = @transform_3, window_bounds = array<i64: 32, 512>}]} {
    %c0_i32 = arith.constant 0 : i32
    %0 = arith.cmpi eq, %arg2, %c0_i32 : i32
    %1 = arith.extui %0 : i1 to i32
    %c0_i32_0 = arith.constant 0 : i32
    %2 = arith.cmpi ne, %1, %c0_i32_0 : i32
    scf.if %2 {
      %cst_10 = arith.constant 0.000000e+00 : f32
      %12 = vector.broadcast %cst_10 : f32 to vector<32x512xf32>
      %c0_11 = arith.constant 0 : index
      %c0_12 = arith.constant 0 : index
      %13 = vector.load %arg7[%c0_11, %c0_12] : memref<32x512xf32, #tpu.memory_space<vmem>>, vector<32x512xf32>
      tpu.vector_store %arg7[%c0_11, %c0_12], %12 {strides = array<i32>} : memref<32x512xf32, #tpu.memory_space<vmem>>, vector<32x512xf32>,
    } else {
    }
    %c0 = arith.constant 0 : index
    %c0_1 = arith.constant 0 : index
    %3 = vector.load %arg7[%c0, %c0_1] : memref<32x512xf32, #tpu.memory_space<vmem>>, vector<32x512xf32>
    %c0_2 = arith.constant 0 : index
    %c0_3 = arith.constant 0 : index
    %4 = vector.load %arg3[%c0_2, %c0_3] : memref<32x512xf32, #tpu.memory_space<vmem>>, vector<32x512xf32>
    %c0_4 = arith.constant 0 : index
    %c0_5 = arith.constant 0 : index
    %5 = vector.load %arg4[%c0_4, %c0_5] : memref<512x512xf32, #tpu.memory_space<vmem>>, vector<512x512xf32>
    %cst = arith.constant dense<0.000000e+00> : vector<32x512xf32>
    %6 = tpu.matmul %4, %5, %cst {dimension_numbers = #tpu.dot_dimension_numbers<[1], [0], [0], [1], [0, 0, 1, 1], [], []>} : vector<32x512xf32>, vector<512x512xf32>, vector<32x512xf32> -> vector<32x512xf32>
    %7 = arith.addf %3, %6 : vector<32x512xf32>
    %c0_6 = arith.constant 0 : index
    %c0_7 = arith.constant 0 : index
    %8 = vector.load %arg7[%c0_6, %c0_7] : memref<32x512xf32, #tpu.memory_space<vmem>>, vector<32x512xf32>
    tpu.vector_store %arg7[%c0_6, %c0_7], %7 {strides = array<i32>} : memref<32x512xf32, #tpu.memory_space<vmem>>, vector<32x512xf32>,
    %c0_i32_8 = arith.constant 0 : i32
    %9 = arith.cmpi eq, %arg2, %c0_i32_8 : i32
    %10 = arith.extui %9 : i1 to i32
    %c0_i32_9 = arith.constant 0 : i32
    %11 = arith.cmpi ne, %10, %c0_i32_9 : i32
    scf.if %11 {
      %c0_10 = arith.constant 0 : index
      %c0_11 = arith.constant 0 : index
      %12 = vector.load %arg7[%c0_10, %c0_11] : memref<32x512xf32, #tpu.memory_space<vmem>>, vector<32x512xf32>
      %c0_12 = arith.constant 0 : index
      %c0_13 = arith.constant 0 : index
      %13 = vector.load %arg5[%c0_12, %c0_13] : memref<1x512xf32, #tpu.memory_space<vmem>>, vector<1x512xf32>
      %14 = vector.broadcast %13 : vector<1x512xf32> to vector<32x512xf32>
      %15 = arith.addf %12, %14 : vector<32x512xf32>
      %c0_14 = arith.constant 0 : index
      %c0_15 = arith.constant 0 : index
      %16 = vector.load %arg6[%c0_14, %c0_15] : memref<32x512xf32, #tpu.memory_space<vmem>>, vector<32x512xf32>
      tpu.vector_store %arg6[%c0_14, %c0_15], %15 {strides = array<i32>} : memref<32x512xf32, #tpu.memory_space<vmem>>, vector<32x512xf32>,
    } else {
    }
    return
  }
  func.func @transform_0(%arg0: i32, %arg1: i32, %arg2: i32) -> (i32, i32) {
    %c0_i32 = arith.constant 0 : i32
    return %arg0, %arg2 : i32, i32
  }
  func.func @transform_1(%arg0: i32, %arg1: i32, %arg2: i32) -> (i32, i32) {
    %c0_i32 = arith.constant 0 : i32
    return %arg2, %arg1 : i32, i32
  }
  func.func @transform_2(%arg0: i32, %arg1: i32, %arg2: i32) -> (i32, i32) {
    %c0_i32 = arith.constant 0 : i32
    %c0_i32_0 = arith.constant 0 : i32
    return %c0_i32, %arg1 : i32, i32
  }
  func.func @transform_3(%arg0: i32, %arg1: i32, %arg2: i32) -> (i32, i32) {
    %c0_i32 = arith.constant 0 : i32
    return %arg0, %arg1 : i32, i32
  }
}

</mosaic_0001>

<bundles_post_ra>
// kernel: tpu_custom_call.1
= control target key start
LH: loop header
LB: loop body
LE: loop exit
PB: predicated region body
PF: predicated region fallthrough
CT: control target
= control target key end

     0   :  { %s2166_s0 = inlined_call_operand.hbm [shape: f32[32,512], index: 0, kind: input, shape index: {}]   ;;  %s2167_s1 = inlined_call_operand.hbm [shape: f32[512,1536], index: 1, kind: input, shape index: {}]   ;;  %s2168_s2 = inlined_call_operand.hbm [shape: f32[1,1536], index: 2, kind: input, shape index: {}]   ;;  %s2169_s3 = inlined_call_operand.hbm [shape: f32[32,1536], index: 3, kind: output, shape index: {}]  }
   0x1   :  { %2172 = sst [smem:[#allocation13_spill]] %s2166_s0 }
   0x2   :  { %2173 = sst [smem:[#allocation14_spill]] %s2167_s1 }
   0x3   :  { %8 = vsyncpa [#allocation4], 0 }
   0x4   :  { %9 = vsyncpa [#allocation7], 0 }
   0x5   :  { %11 = vsyncpa [#allocation7 + $0x1], 0 }
   0x6   :  { %12 = vsyncpa [#allocation5], 0 }
   0x7   :  { %14 = vsyncpa [#allocation5 + $0x1], 0  ;;  %s1612_s12 = smov 0   ;;  %s1614_s13 = smov 0  }
   0x8   :  { %s1616_s14 = smov 0   ;;  %s1618_s15 = smov 0  }
   0x9   :  { %s1620_s16 = smov 0   ;;  %s1622_s17 = smov 0  }
   0xa LB: > { %s35_s18 = sadd.s32 1, %s1579_s16  ;;  %s76_s19 = sadd.s32 1, %s1571_s14  ;;  %s1583_s17 = sphi %s1622_s17, %s20_s17   ;;  %s1579_s16 = sphi %s1620_s16, %s2188_s16   ;;  %s1575_s15 = sphi %s1618_s15, %s2187_s15   ;;  %s1571_s14 = sphi %s1616_s14, %s2186_s14   ;;  %s1567_s13 = sphi %s1614_s13, %s2185_s13   ;;  %s1563_s12 = sphi %s1612_s12, %s2184_s12  }
   0xb   : > { %p37_p0 = scmp.ge.s32.totalorder %s35_s18, 3  ;;  %p83_p1 = scmp.ne.s32.totalorder %s1571_s14, %s1567_s13 }
   0xc   : > { %p84_p2 = scmp.eq.s32.totalorder %s1583_s17, 0  ;;  %p1349_p5 = scmp.lt.s32.totalorder %s1583_s17, 3 }
   0xd   : > { %s2190_s18 = smov (%p37_p0, %s35_s18), 0  ;;  %s187_s22 = sand.u32 1, %s1583_s17  }
   0xe   : > { %p1652_p3 = por %p84_p2, %p83_p1  ;;  %s72_s21 = ssub.s32 %s1579_s16, %s2190_s18 }
   0xf   : > { %p74_p4 = scmp.eq.s32.totalorder %s72_s21, 0  ;;  %s189_s23 = sand.u32 1, %s1571_s14  }
  0x10   : > { %s1306_s25 = sshll.u32 %s189_s23, 11  ;;  %s1321_s26 = sshll.u32 %s1579_s16, 5 }
  0x11   : > { %s1662_s24 = scalar_select %p74_p4, %s1571_s14, %s76_s19  }
  0x12   : > { %s2175_s1 = sld [smem:[#allocation14_spill]]  ;;  %s191_s30 = scalar_lea.vmem [#allocation6], %s1306_s25 }
  0x13   : > { %s202_s4 = sshll.u32 %s191_s30, 4  ;;  %p1672_p6 = pnand %p1349_p5, %p1652_p3  ;;  %s203_s4 = int_to_ptr.vmem [resolvable:$true] %s202_s4 }
  0x14   : > { %s1676_s7 = scalar_lea.sflag [#allocation7], %s187_s22  ;;  %s1585_s8 = smov 1536  }
  0x15   : > { %s2170_s9 = smov 512   ;;  %s2171_s10 = smov 32  }
  0x16   : > { %s1684_s11 = sadd.s32 4294967295, %s1583_s17   ;;  %s1302_s19 = sadd.s32 4294967294, %s1583_s17  }
  0x17   : > { %p89_p7 = scmp.ne.s32.totalorder %s1567_s13, %s1563_s12  ;;  %p90_p8 = scmp.eq.s32.totalorder %s1684_s11, 0 }
  0x18   : > { %s199_s29 = scalar_lea.hbm %s2175_s1, %s1321_s26  ;;  %p141_p9 = scmp.eq.s32.totalorder %s1684_s11, 2 }
  0x19   : > { %s200_s5 = sshll.u32 %s199_s29, 4  ;;  %p147_p10 = scmp.eq.s32.totalorder %s1302_s19, 2  ;;  %s201_s5 = int_to_ptr.hbm [resolvable:$true] %s200_s5 }
  0x1a   : > { %1340 = dma.hbm_to_vmem [thread:$0]  (!%p1672_p6), %s201_s5, 32768, %s203_s4, %s1676_s7, %s1585_s8, %s2170_s9, %s2171_s10  }
  0x1b   : > { %p1693_p11 = por %p90_p8, %p89_p7  ;;  %p1303_p12 = scmp.ge.s32.totalorder %s1583_s17, 1 }
  0x1c   : > { %p1701_p13 = por %p141_p9, %p83_p1  ;;  %p1705_p0 = por %p147_p10, %p89_p7 }
  0x1d   : > { %p154_p2 = scmp.lt.s32.totalorder %s1583_s17, 4  ;;  %s2180_s0 = sld [smem:[#allocation13_spill]] }
  0x1e   : > { %s1588_s29 = smov [#allocation3]   ;;  %s1309_s4 = sshll.u32 %s189_s23, 2 }
  0x1f   : > { %p1713_p3 = pnand %p1303_p12, %p154_p2  ;;  %s173_s30 = sshll.u32 %s1588_s29, 4  ;;  %s174_s30 = int_to_ptr.vmem [resolvable:$true] %s173_s30 }
  0x20   : > { %s1310_s5 = sshll.u32 %s1579_s16, 2  ;;  %s216_s9 = scalar_lea.vmem [#allocation8], %s1309_s4 }
  0x21   : > { %p1333_p1 = pneg %p1713_p3  ;;  %s220_s25 = scalar_lea.hbm %s2168_s2, %s1310_s5 }
  0x22   : > { %s222_s26 = sshll.u32 %s220_s25, 4  ;;  %s224_s10 = sshll.u32 %s216_s9, 4  ;;  %s223_s26 = int_to_ptr.hbm [resolvable:$true] %s222_s26  ;;  %s225_s10 = int_to_ptr.vmem [resolvable:$true] %s224_s10 }
  0x23   : > { %s171_s27 = sshll.u32 %s2180_s0, 4  ;;  %p1334_p4 = pnand %p1333_p1, %p90_p8  ;;  %s172_s27 = int_to_ptr.hbm [resolvable:$true] %s171_s27 }
  0x24   : > { %s2182_s0 = smov 32   ;;  %s2183_s1 = smov 512  }
  0x25   : > { %1336 = dma.hbm_to_vmem [thread:$0]  (!%p1334_p4), %s172_s27, 2048, %s174_s30, [#allocation4], %s2183_s1, %s2183_s1, %s2182_s0  }
  0x26   : > { %1343 = dma.hbm_to_vmem [thread:$0]  (!%p1672_p6), %s223_s26, 64, %s225_s10, %s1676_s7  }
  0x27   : > { %233 = sbr.rel (%p1713_p3) target bundleno = 398 (0x18e), region = 32 }
  0x2c   : > { %1550 = dma.done.wait (%p90_p8), [#allocation4], 2048  }
  0x2d   : > { %1552 = vsyncadd (%p90_p8), [#allocation4], 4294965248  ;;  %s240_s23 = sand.u32 1, %s1684_s11   ;;  %s1741_s9 = sand.u32 1, %s1567_s13  }
  0x2e   : > { %s1313_s0 = sshll.u32 %s1741_s9, 11  ;;  %s241_s1 = scalar_lea.sflag [#allocation7], %s240_s23 }
  0x2f   : > { %s1744_s6 = scalar_lea.vmem [#allocation6], %s1313_s0 }
  0x30   : > { %1554 = dma.done.wait (%p1693_p11), %s241_s1, 32832  }
  0x31   : > { %1556 = vsyncadd (%p1693_p11), %s241_s1, 4294934464  ;;  %v530_v0 = vld [vmem:[%s1744_s6 + $0x5e0] sm:$0xff]  ;;  %v1812_v62 = vld [vmem:[#allocation3 + $0x10] sm:$0xff]  ;;  %s1314_s7 = sshll.u32 %s1741_s9, 2  ;;  %s1315_s11 = sshll.u32 %s1741_s9, 7 }
  0x32   : > { %v526_v1 = vld [vmem:[%s1744_s6 + $0x5c0] sm:$0xff]  ;;  %656 = vmatpush.msra.mxu2 %v530_v0  ;;  %v1814_v63 = vld [vmem:[#allocation3 + $0x18] sm:$0xff]  ;;  %v531_v0 = vld [vmem:[%s1744_s6 + $0x5e8] sm:$0xff]  ;;  %s254_s10 = scalar_lea.vmem [#allocation8], %s1314_s7  ;;  %s2103_s20 = scalar_lea.vmem [#allocation9], %s1315_s11 }
  0x33   : > { %v594_v2 = vld [vmem:[%s1744_s6 + $0x7e0] sm:$0xff]  ;;  %s1322_s27 = sshll.u32 %s1575_s15, 5  ;;  %s1171_s4 = sshll.u32 %s2103_s20, 4  ;;  %s1172_s4 = int_to_ptr.vmem [resolvable:$true] %s1171_s4 }
  0x34   : > { %685 = vmatpush.msra.mxu3 %v594_v2  ;;  %v402_v3 = vld [vmem:[%s1744_s6 + $0x1e0] sm:$0xff]  ;;  %657 = vmatpush.msra.mxu2 %v526_v1  ;;  %v595_v1 = vld [vmem:[%s1744_s6 + $0x7e8] sm:$0xff]  ;;  %s1170_s30 = scalar_lea.hbm %s2169_s3, %s1322_s27  ;;  %s1156_s15 = scalar_lea.sflag [#allocation5], %s1741_s9 }
  0x35   : > { %v466_v4 = vld [vmem:[%s1744_s6 + $0x3e0] sm:$0xff]  ;;  %598 = vmatpush.msra.mxu0 %v402_v3  ;;  %s1173_s5 = sshll.u32 %s1170_s30, 4  ;;  %s1517_s23 = scalar_lea.hbm %s2169_s3, 384  ;;  %s1174_s5 = int_to_ptr.hbm [resolvable:$true] %s1173_s5 }
  0x36   : > { %v522_v5 = vld [vmem:[%s1744_s6 + $0x5a0] sm:$0xff]  ;;  %627 = vmatpush.msra.mxu1 %v466_v4  ;;  %v527_v4 = vld [vmem:[%s1744_s6 + $0x5c8] sm:$0xff]  ;;  %s1511_s8 = sshra.s32 %s1174_s5, 4  ;;  %s1512_s8 = int_to_ptr.hbm [resolvable:$true] %s1511_s8 }
  0x37   : > { %v590_v6 = vld [vmem:[%s1744_s6 + $0x7c0] sm:$0xff]  ;;  %658 = vmatpush.msra.mxu2 %v522_v5  ;;  %s1513_s19 = scalar_lea.hbm %s1512_s8, 128  ;;  %p1518_p8 = scmp.lt.s32.totalorder %s1512_s8, %s2169_s3 }
  0x38   : > { %v398_v7 = vld [vmem:[%s1744_s6 + $0x1c0] sm:$0xff]  ;;  %686 = vmatpush.msra.mxu3 %v590_v6  ;;  %v1825_v6 = vld [vmem:[#allocation3 + $0x8] sm:$0xff]  ;;  %p1514_p5 = scmp.ne.s32.totalorder %s1512_s8, %s1513_s19  ;;  %p1519_p9 = scmp.lt.s32.totalorder %s1517_s23, %s1513_s19 }
  0x39   : > { %v462_v8 = vld [vmem:[%s1744_s6 + $0x3c0] sm:$0xff]  ;;  %599 = vmatpush.msra.mxu0 %v398_v7  ;;  %v403_v7 = vld [vmem:[%s1744_s6 + $0x1e8] sm:$0xff] }
  0x3a   : > { %v586_v9 = vld [vmem:[%s1744_s6 + $0x7a0] sm:$0xff]  ;;  %628 = vmatpush.msra.mxu1 %v462_v8  ;;  %v467_v8 = vld [vmem:[%s1744_s6 + $0x3e8] sm:$0xff]  ;;  %p1515_p6 = pnand %p1514_p5, %p1701_p13  ;;  %p1520_p10 = por %p1519_p9, %p1518_p8 }
  0x3b   : > { %v394_v10 = vld [vmem:[%s1744_s6 + $0x1a0] sm:$0xff]  ;;  %687 = vmatpush.msra.mxu3 %v586_v9  ;;  %v523_v9 = vld [vmem:[%s1744_s6 + $0x5a8] sm:$0xff] }
  0x3c   : > { %v518_v11 = vld [vmem:[%s1744_s6 + $0x580] sm:$0xff]  ;;  %600 = vmatpush.msra.mxu0 %v394_v10  ;;  %v591_v10 = vld [vmem:[%s1744_s6 + $0x7c8] sm:$0xff]  ;;  %p1516_p7 = pneg %p1515_p6 }
  0x3d   : > { %v458_v12 = vld [vmem:[%s1744_s6 + $0x3a0] sm:$0xff]  ;;  %659 = vmatpush.msra.mxu2 %v518_v11  ;;  %v399_v11 = vld [vmem:[%s1744_s6 + $0x1c8] sm:$0xff] }
  0x3e   : > { %v582_v13 = vld [vmem:[%s1744_s6 + $0x780] sm:$0xff]  ;;  %629 = vmatpush.msra.mxu1 %v458_v12  ;;  %v463_v12 = vld [vmem:[%s1744_s6 + $0x3c8] sm:$0xff]  ;;  %p1521_p11 = pnand %p1520_p10, %p1516_p7 }
  0x3f   : > { %v390_v14 = vld [vmem:[%s1744_s6 + $0x180] sm:$0xff]  ;;  %688 = vmatpush.msra.mxu3 %v582_v13  ;;  %v519_v13 = vld [vmem:[%s1744_s6 + $0x588] sm:$0xff] }
  0x40   : > { %v454_v15 = vld [vmem:[%s1744_s6 + $0x380] sm:$0xff]  ;;  %601 = vmatpush.msra.mxu0 %v390_v14  ;;  %v587_v14 = vld [vmem:[%s1744_s6 + $0x7a8] sm:$0xff] }
  0x41   : > { %v514_v16 = vld [vmem:[%s1744_s6 + $0x560] sm:$0xff]  ;;  %630 = vmatpush.msra.mxu1 %v454_v15  ;;  %v1837_v15 = vld [vmem:[#allocation3 + $0x30] sm:$0xff] }
  0x42   : > { %v578_v17 = vld [vmem:[%s1744_s6 + $0x760] sm:$0xff]  ;;  %660 = vmatpush.msra.mxu2 %v514_v16  ;;  %v395_v16 = vld [vmem:[%s1744_s6 + $0x1a8] sm:$0xff] }
  0x43   : > { %v386_v18 = vld [vmem:[%s1744_s6 + $0x160] sm:$0xff]  ;;  %689 = vmatpush.msra.mxu3 %v578_v17  ;;  %v459_v17 = vld [vmem:[%s1744_s6 + $0x3a8] sm:$0xff] }
  0x44   : > { %v450_v19 = vld [vmem:[%s1744_s6 + $0x360] sm:$0xff]  ;;  %602 = vmatpush.msra.mxu0 %v386_v18  ;;  %v515_v18 = vld [vmem:[%s1744_s6 + $0x568] sm:$0xff] }
  0x45   : > { %v510_v20 = vld [vmem:[%s1744_s6 + $0x540] sm:$0xff]  ;;  %631 = vmatpush.msra.mxu1 %v450_v19  ;;  %v583_v19 = vld [vmem:[%s1744_s6 + $0x788] sm:$0xff] }
  0x46   : > { %v574_v21 = vld [vmem:[%s1744_s6 + $0x740] sm:$0xff]  ;;  %661 = vmatpush.msra.mxu2 %v510_v20  ;;  %v1844_v20 = vld [vmem:[#allocation3 + $0x38] sm:$0xff] }
  0x47   : > { %v382_v22 = vld [vmem:[%s1744_s6 + $0x140] sm:$0xff]  ;;  %690 = vmatpush.msra.mxu3 %v574_v21  ;;  %v391_v21 = vld [vmem:[%s1744_s6 + $0x188] sm:$0xff] }
  0x48   : > { %v446_v23 = vld [vmem:[%s1744_s6 + $0x340] sm:$0xff]  ;;  %603 = vmatpush.msra.mxu0 %v382_v22  ;;  %v455_v22 = vld [vmem:[%s1744_s6 + $0x388] sm:$0xff] }
  0x49   : > { %v506_v24 = vld [vmem:[%s1744_s6 + $0x520] sm:$0xff]  ;;  %632 = vmatpush.msra.mxu1 %v446_v23  ;;  %v511_v23 = vld [vmem:[%s1744_s6 + $0x548] sm:$0xff] }
  0x4a   : > { %v570_v25 = vld [vmem:[%s1744_s6 + $0x720] sm:$0xff]  ;;  %662 = vmatpush.msra.mxu2 %v506_v24  ;;  %v579_v24 = vld [vmem:[%s1744_s6 + $0x768] sm:$0xff] }
  0x4b   : > { %v378_v26 = vld [vmem:[%s1744_s6 + $0x120] sm:$0xff]  ;;  %691 = vmatpush.msra.mxu3 %v570_v25 }
  0x4c   : > { %v442_v27 = vld [vmem:[%s1744_s6 + $0x320] sm:$0xff]  ;;  %604 = vmatpush.msra.mxu0 %v378_v26  ;;  %v1853_v26 = vld [vmem:[#allocation3 + $0x28] sm:$0xff] }
  0x4d   : > { %v502_v28 = vld [vmem:[%s1744_s6 + $0x500] sm:$0xff]  ;;  %633 = vmatpush.msra.mxu1 %v442_v27  ;;  %v387_v27 = vld [vmem:[%s1744_s6 + $0x168] sm:$0xff] }
  0x4e   : > { %v566_v29 = vld [vmem:[%s1744_s6 + $0x700] sm:$0xff]  ;;  %663 = vmatpush.msra.mxu2 %v502_v28  ;;  %v451_v28 = vld [vmem:[%s1744_s6 + $0x368] sm:$0xff] }
  0x4f   : > { %v374_v30 = vld [vmem:[%s1744_s6 + $0x100] sm:$0xff]  ;;  %692 = vmatpush.msra.mxu3 %v566_v29  ;;  %v507_v29 = vld [vmem:[%s1744_s6 + $0x528] sm:$0xff] }
  0x50   : > { %v438_v31 = vld [vmem:[%s1744_s6 + $0x300] sm:$0xff]  ;;  %605 = vmatpush.msra.mxu0 %v374_v30  ;;  %v575_v30 = vld [vmem:[%s1744_s6 + $0x748] sm:$0xff] }
  0x51   : > { %v498_v32 = vld [vmem:[%s1744_s6 + $0x4e0] sm:$0xff]  ;;  %634 = vmatpush.msra.mxu1 %v438_v31  ;;  %v383_v31 = vld [vmem:[%s1744_s6 + $0x148] sm:$0xff] }
  0x52   : > { %v562_v33 = vld [vmem:[%s1744_s6 + $0x6e0] sm:$0xff]  ;;  %664 = vmatpush.msra.mxu2 %v498_v32  ;;  %v447_v32 = vld [vmem:[%s1744_s6 + $0x348] sm:$0xff] }
  0x53   : > { %v370_v34 = vld [vmem:[%s1744_s6 + $0xe0] sm:$0xff]  ;;  %693 = vmatpush.msra.mxu3 %v562_v33  ;;  %v503_v33 = vld [vmem:[%s1744_s6 + $0x508] sm:$0xff] }
  0x54   : > { %v434_v35 = vld [vmem:[%s1744_s6 + $0x2e0] sm:$0xff]  ;;  %606 = vmatpush.msra.mxu0 %v370_v34  ;;  %v571_v34 = vld [vmem:[%s1744_s6 + $0x728] sm:$0xff] }
  0x55   : > { %v494_v36 = vld [vmem:[%s1744_s6 + $0x4c0] sm:$0xff]  ;;  %635 = vmatpush.msra.mxu1 %v434_v35  ;;  %v1865_v35 = vld [vmem:[#allocation3 + $0x50] sm:$0xff] }
  0x56   : > { %v558_v37 = vld [vmem:[%s1744_s6 + $0x6c0] sm:$0xff]  ;;  %665 = vmatpush.msra.mxu2 %v494_v36  ;;  %v379_v36 = vld [vmem:[%s1744_s6 + $0x128] sm:$0xff] }
  0x57   : > { %v366_v38 = vld [vmem:[%s1744_s6 + $0xc0] sm:$0xff]  ;;  %694 = vmatpush.msra.mxu3 %v558_v37  ;;  %v443_v37 = vld [vmem:[%s1744_s6 + $0x328] sm:$0xff] }
  0x58   : > { %v430_v39 = vld [vmem:[%s1744_s6 + $0x2c0] sm:$0xff]  ;;  %607 = vmatpush.msra.mxu0 %v366_v38  ;;  %v499_v38 = vld [vmem:[%s1744_s6 + $0x4e8] sm:$0xff] }
  0x59   : > { %v490_v40 = vld [vmem:[%s1744_s6 + $0x4a0] sm:$0xff]  ;;  %636 = vmatpush.msra.mxu1 %v430_v39  ;;  %v567_v39 = vld [vmem:[%s1744_s6 + $0x708] sm:$0xff] }
  0x5a   : > { %v554_v41 = vld [vmem:[%s1744_s6 + $0x6a0] sm:$0xff]  ;;  %666 = vmatpush.msra.mxu2 %v490_v40  ;;  %v1872_v40 = vld [vmem:[#allocation3 + $0x58] sm:$0xff] }
  0x5b   : > { %v362_v42 = vld [vmem:[%s1744_s6 + $0xa0] sm:$0xff]  ;;  %695 = vmatpush.msra.mxu3 %v554_v41  ;;  %v375_v41 = vld [vmem:[%s1744_s6 + $0x108] sm:$0xff] }
  0x5c   : > { %v426_v43 = vld [vmem:[%s1744_s6 + $0x2a0] sm:$0xff]  ;;  %608 = vmatpush.msra.mxu0 %v362_v42  ;;  %v439_v42 = vld [vmem:[%s1744_s6 + $0x308] sm:$0xff] }
  0x5d   : > { %v486_v44 = vld [vmem:[%s1744_s6 + $0x480] sm:$0xff]  ;;  %637 = vmatpush.msra.mxu1 %v426_v43  ;;  %v495_v43 = vld [vmem:[%s1744_s6 + $0x4c8] sm:$0xff] }
  0x5e   : > { %v550_v45 = vld [vmem:[%s1744_s6 + $0x680] sm:$0xff]  ;;  %667 = vmatpush.msra.mxu2 %v486_v44  ;;  %v563_v44 = vld [vmem:[%s1744_s6 + $0x6e8] sm:$0xff] }
  0x5f   : > { %v358_v46 = vld [vmem:[%s1744_s6 + $0x80] sm:$0xff]  ;;  %696 = vmatpush.msra.mxu3 %v550_v45 }
  0x60   : > { %v422_v47 = vld [vmem:[%s1744_s6 + $0x280] sm:$0xff]  ;;  %609 = vmatpush.msra.mxu0 %v358_v46  ;;  %v1881_v46 = vld [vmem:[#allocation3 + $0x48] sm:$0xff] }
  0x61   : > { %v482_v48 = vld [vmem:[%s1744_s6 + $0x460] sm:$0xff]  ;;  %638 = vmatpush.msra.mxu1 %v422_v47  ;;  %v371_v47 = vld [vmem:[%s1744_s6 + $0xe8] sm:$0xff] }
  0x62   : > { %v546_v49 = vld [vmem:[%s1744_s6 + $0x660] sm:$0xff]  ;;  %668 = vmatpush.msra.mxu2 %v482_v48  ;;  %v435_v48 = vld [vmem:[%s1744_s6 + $0x2e8] sm:$0xff] }
  0x63   : > { %v354_v50 = vld [vmem:[%s1744_s6 + $0x60] sm:$0xff]  ;;  %697 = vmatpush.msra.mxu3 %v546_v49  ;;  %v491_v49 = vld [vmem:[%s1744_s6 + $0x4a8] sm:$0xff] }
  0x64   : > { %v418_v51 = vld [vmem:[%s1744_s6 + $0x260] sm:$0xff]  ;;  %610 = vmatpush.msra.mxu0 %v354_v50  ;;  %v559_v50 = vld [vmem:[%s1744_s6 + $0x6c8] sm:$0xff] }
  0x65   : > { %v478_v52 = vld [vmem:[%s1744_s6 + $0x440] sm:$0xff]  ;;  %639 = vmatpush.msra.mxu1 %v418_v51  ;;  %v367_v51 = vld [vmem:[%s1744_s6 + $0xc8] sm:$0xff] }
  0x66   : > { %v542_v53 = vld [vmem:[%s1744_s6 + $0x640] sm:$0xff]  ;;  %669 = vmatpush.msra.mxu2 %v478_v52  ;;  %v431_v52 = vld [vmem:[%s1744_s6 + $0x2c8] sm:$0xff] }
  0x67   : > { %v350_v54 = vld [vmem:[%s1744_s6 + $0x40] sm:$0xff]  ;;  %698 = vmatpush.msra.mxu3 %v542_v53  ;;  %v487_v53 = vld [vmem:[%s1744_s6 + $0x488] sm:$0xff] }
  0x68   : > { %v414_v55 = vld [vmem:[%s1744_s6 + $0x240] sm:$0xff]  ;;  %611 = vmatpush.msra.mxu0 %v350_v54  ;;  %v555_v54 = vld [vmem:[%s1744_s6 + $0x6a8] sm:$0xff] }
  0x69   : > { %v474_v56 = vld [vmem:[%s1744_s6 + $0x420] sm:$0xff]  ;;  %640 = vmatpush.msra.mxu1 %v414_v55  ;;  %v1893_v55 = vld [vmem:[#allocation3 + $0x70] sm:$0xff] }
  0x6a   : > { %v538_v57 = vld [vmem:[%s1744_s6 + $0x620] sm:$0xff]  ;;  %670 = vmatpush.msra.mxu2 %v474_v56  ;;  %v363_v56 = vld [vmem:[%s1744_s6 + $0xa8] sm:$0xff] }
  0x6b   : > { %v346_v58 = vld [vmem:[%s1744_s6 + $0x20] sm:$0xff]  ;;  %699 = vmatpush.msra.mxu3 %v538_v57  ;;  %v427_v57 = vld [vmem:[%s1744_s6 + $0x2a8] sm:$0xff] }
  0x6c   : > { %v410_v59 = vld [vmem:[%s1744_s6 + $0x220] sm:$0xff]  ;;  %612 = vmatpush.msra.mxu0 %v346_v58  ;;  %v483_v58 = vld [vmem:[%s1744_s6 + $0x468] sm:$0xff] }
  0x6d   : > { %v470_v60 = vld [vmem:[%s1744_s6 + $0x400] sm:$0xff]  ;;  %641 = vmatpush.msra.mxu1 %v410_v59  ;;  %v551_v59 = vld [vmem:[%s1744_s6 + $0x688] sm:$0xff] }
  0x6e   : > { %v534_v61 = vld [vmem:[%s1744_s6 + $0x600] sm:$0xff]  ;;  %671 = vmatpush.msra.mxu2 %v470_v60  ;;  %v1900_v60 = vld [vmem:[#allocation3 + $0x78] sm:$0xff] }
  0x6f   : > { %700 = vmatpush.msra.mxu3 %v534_v61  ;;  %v342_v2 = vld [vmem:[%s1744_s6] sm:$0xff]  ;;  %672 = vmatmul.f32.vlgmr.msra.gmra.mxu2 %v1812_v62  ;;  %v359_v61 = vld [vmem:[%s1744_s6 + $0x88] sm:$0xff] }
  0x70   : > { %v406_v3 = vld [vmem:[%s1744_s6 + $0x200] sm:$0xff]  ;;  %701 = vmatmul.f32.vlgmr.msra.gmra.mxu3 %v1814_v63  ;;  %772 = vmatpush.msrb.mxu2 %v531_v0  ;;  %v423_v0 = vld [vmem:[%s1744_s6 + $0x288] sm:$0xff] }
  0x71   : > { %v1823_v5 = vld [vmem:[#allocation3] sm:$0xff]  ;;  %801 = vmatpush.msrb.mxu3 %v595_v1  ;;  %613 = vmatpush.msra.mxu0 %v342_v2  ;;  %v479_v1 = vld [vmem:[%s1744_s6 + $0x448] sm:$0xff] }
  0x72   : > { %642 = vmatpush.msra.mxu1 %v406_v3  ;;  %773 = vmatpush.msrb.mxu2 %v527_v4  ;;  %v1850_v25 = vld [vmem:[#allocation3 + $0x20] sm:$0xff]  ;;  %v547_v2 = vld [vmem:[%s1744_s6 + $0x668] sm:$0xff] }
  0x73   : > { %614 = vmatmul.f32.vlgmr.msra.gmra.mxu0 %v1823_v5  ;;  %643 = vmatmul.f32.vlgmr.msra.gmra.mxu1 %v1825_v6  ;;  %v1878_v45 = vld [vmem:[#allocation3 + $0x40] sm:$0xff]  ;;  %v1909_v4 = vld [vmem:[#allocation3 + $0x68] sm:$0xff] }
  0x74   : > { %714 = vmatpush.msrb.mxu0 %v403_v7  ;;  %743 = vmatpush.msrb.mxu1 %v467_v8  ;;  %v1906_v3 = vld [vmem:[#allocation3 + $0x60] sm:$0xff]  ;;  %v355_v7 = vld [vmem:[%s1744_s6 + $0x68] sm:$0xff] }
  0x75   : > { %774 = vmatpush.msrb.mxu2 %v523_v9  ;;  %802 = vmatpush.msrb.mxu3 %v591_v10  ;;  %v419_v8 = vld [vmem:[%s1744_s6 + $0x268] sm:$0xff] }
  0x76   : > { %715 = vmatpush.msrb.mxu0 %v399_v11  ;;  %744 = vmatpush.msrb.mxu1 %v463_v12  ;;  %v475_v9 = vld [vmem:[%s1744_s6 + $0x428] sm:$0xff] }
  0x77   : > { %775 = vmatpush.msrb.mxu2 %v519_v13  ;;  %803 = vmatpush.msrb.mxu3 %v587_v14  ;;  %v543_v10 = vld [vmem:[%s1744_s6 + $0x648] sm:$0xff] }
  0x78   : > { %675 = vmatmul.f32.gmra.mxu2 %v1837_v15  ;;  %716 = vmatpush.msrb.mxu0 %v395_v16  ;;  %v351_v11 = vld [vmem:[%s1744_s6 + $0x48] sm:$0xff] }
  0x79   : > { %745 = vmatpush.msrb.mxu1 %v459_v17  ;;  %776 = vmatpush.msrb.mxu2 %v515_v18  ;;  %v415_v12 = vld [vmem:[%s1744_s6 + $0x248] sm:$0xff] }
  0x7a   : > { %804 = vmatpush.msrb.mxu3 %v583_v19  ;;  %717 = vmatpush.msrb.mxu0 %v391_v21  ;;  %v471_v13 = vld [vmem:[%s1744_s6 + $0x408] sm:$0xff]  ;;  %v532_v19 = vld [vmem:[%s1744_s6 + $0x5f0] sm:$0xff] }
  0x7b   : > { %704 = vmatmul.f32.gmra.mxu3 %v1844_v20  ;;  %746 = vmatpush.msrb.mxu1 %v455_v22  ;;  %v539_v14 = vld [vmem:[%s1744_s6 + $0x628] sm:$0xff] }
  0x7c   : > { %777 = vmatpush.msrb.mxu2 %v511_v23  ;;  %805 = vmatpush.msrb.mxu3 %v579_v24  ;;  %v347_v16 = vld [vmem:[%s1744_s6 + $0x28] sm:$0xff]  ;;  %v528_v23 = vld [vmem:[%s1744_s6 + $0x5d0] sm:$0xff] }
  0x7d   : > { %617 = vmatmul.f32.gmra.mxu0 %v1850_v25  ;;  %646 = vmatmul.f32.gmra.mxu1 %v1853_v26  ;;  %v411_v17 = vld [vmem:[%s1744_s6 + $0x228] sm:$0xff]  ;;  %v596_v24 = vld [vmem:[%s1744_s6 + $0x7f0] sm:$0xff] }
  0x7e   : > { %718 = vmatpush.msrb.mxu0 %v387_v27  ;;  %747 = vmatpush.msrb.mxu1 %v451_v28  ;;  %v535_v18 = vld [vmem:[%s1744_s6 + $0x608] sm:$0xff]  ;;  %v404_v27 = vld [vmem:[%s1744_s6 + $0x1f0] sm:$0xff] }
  0x7f   : > { %778 = vmatpush.msrb.mxu2 %v507_v29  ;;  %806 = vmatpush.msrb.mxu3 %v575_v30  ;;  %v343_v21 = vld [vmem:[%s1744_s6 + $0x8] sm:$0xff]  ;;  %v468_v28 = vld [vmem:[%s1744_s6 + $0x3f0] sm:$0xff] }
  0x80   : > { %719 = vmatpush.msrb.mxu0 %v383_v31  ;;  %748 = vmatpush.msrb.mxu1 %v447_v32  ;;  %v407_v22 = vld [vmem:[%s1744_s6 + $0x208] sm:$0xff]  ;;  %v524_v29 = vld [vmem:[%s1744_s6 + $0x5b0] sm:$0xff] }
  0x81   : > { %779 = vmatpush.msrb.mxu2 %v503_v33  ;;  %807 = vmatpush.msrb.mxu3 %v571_v34  ;;  %v592_v30 = vld [vmem:[%s1744_s6 + $0x7d0] sm:$0xff] }
  0x82   : > { %678 = vmatmul.f32.gmra.mxu2 %v1865_v35  ;;  %720 = vmatpush.msrb.mxu0 %v379_v36  ;;  %v400_v31 = vld [vmem:[%s1744_s6 + $0x1d0] sm:$0xff] }
  0x83   : > { %749 = vmatpush.msrb.mxu1 %v443_v37  ;;  %780 = vmatpush.msrb.mxu2 %v499_v38  ;;  %v464_v32 = vld [vmem:[%s1744_s6 + $0x3d0] sm:$0xff] }
  0x84   : > { %808 = vmatpush.msrb.mxu3 %v567_v39  ;;  %721 = vmatpush.msrb.mxu0 %v375_v41  ;;  %v520_v33 = vld [vmem:[%s1744_s6 + $0x590] sm:$0xff] }
  0x85   : > { %707 = vmatmul.f32.gmra.mxu3 %v1872_v40  ;;  %750 = vmatpush.msrb.mxu1 %v439_v42  ;;  %v588_v34 = vld [vmem:[%s1744_s6 + $0x7b0] sm:$0xff] }
  0x86   : > { %781 = vmatpush.msrb.mxu2 %v495_v43  ;;  %809 = vmatpush.msrb.mxu3 %v563_v44  ;;  %v396_v36 = vld [vmem:[%s1744_s6 + $0x1b0] sm:$0xff] }
  0x87   : > { %620 = vmatmul.f32.gmra.mxu0 %v1878_v45  ;;  %649 = vmatmul.f32.gmra.mxu1 %v1881_v46  ;;  %v460_v37 = vld [vmem:[%s1744_s6 + $0x3b0] sm:$0xff] }
  0x88   : > { %722 = vmatpush.msrb.mxu0 %v371_v47  ;;  %751 = vmatpush.msrb.mxu1 %v435_v48  ;;  %v516_v38 = vld [vmem:[%s1744_s6 + $0x570] sm:$0xff] }
  0x89   : > { %782 = vmatpush.msrb.mxu2 %v491_v49  ;;  %810 = vmatpush.msrb.mxu3 %v559_v50  ;;  %v584_v39 = vld [vmem:[%s1744_s6 + $0x790] sm:$0xff] }
  0x8a   : > { %723 = vmatpush.msrb.mxu0 %v367_v51  ;;  %752 = vmatpush.msrb.mxu1 %v431_v52  ;;  %v392_v41 = vld [vmem:[%s1744_s6 + $0x190] sm:$0xff] }
  0x8b   : > { %783 = vmatpush.msrb.mxu2 %v487_v53  ;;  %811 = vmatpush.msrb.mxu3 %v555_v54  ;;  %v456_v42 = vld [vmem:[%s1744_s6 + $0x390] sm:$0xff] }
  0x8c   : > { %681 = vmatmul.f32.gmra.mxu2 %v1893_v55  ;;  %724 = vmatpush.msrb.mxu0 %v363_v56  ;;  %v512_v43 = vld [vmem:[%s1744_s6 + $0x550] sm:$0xff] }
  0x8d   : > { %753 = vmatpush.msrb.mxu1 %v427_v57  ;;  %784 = vmatpush.msrb.mxu2 %v483_v58  ;;  %v580_v44 = vld [vmem:[%s1744_s6 + $0x770] sm:$0xff] }
  0x8e   : > { %812 = vmatpush.msrb.mxu3 %v551_v59  ;;  %725 = vmatpush.msrb.mxu0 %v359_v61  ;;  %v388_v47 = vld [vmem:[%s1744_s6 + $0x170] sm:$0xff] }
  0x8f   : > { %710 = vmatmul.f32.gmra.mxu3 %v1900_v60  ;;  %754 = vmatpush.msrb.mxu1 %v423_v0  ;;  %v452_v48 = vld [vmem:[%s1744_s6 + $0x370] sm:$0xff] }
  0x90   : > { %785 = vmatpush.msrb.mxu2 %v479_v1  ;;  %813 = vmatpush.msrb.mxu3 %v547_v2  ;;  %v508_v49 = vld [vmem:[%s1744_s6 + $0x530] sm:$0xff] }
  0x91   : > { %623 = vmatmul.f32.gmra.mxu0 %v1906_v3  ;;  %652 = vmatmul.f32.gmra.mxu1 %v1909_v4  ;;  %v576_v50 = vld [vmem:[%s1744_s6 + $0x750] sm:$0xff] }
  0x92   : > { %726 = vmatpush.msrb.mxu0 %v355_v7  ;;  %755 = vmatpush.msrb.mxu1 %v419_v8  ;;  %v384_v51 = vld [vmem:[%s1744_s6 + $0x150] sm:$0xff] }
  0x93   : > { %786 = vmatpush.msrb.mxu2 %v475_v9  ;;  %814 = vmatpush.msrb.mxu3 %v543_v10  ;;  %v448_v52 = vld [vmem:[%s1744_s6 + $0x350] sm:$0xff] }
  0x94   : > { %727 = vmatpush.msrb.mxu0 %v351_v11  ;;  %756 = vmatpush.msrb.mxu1 %v415_v12  ;;  %v504_v53 = vld [vmem:[%s1744_s6 + $0x510] sm:$0xff] }
  0x95   : > { %787 = vmatpush.msrb.mxu2 %v471_v13  ;;  %815 = vmatpush.msrb.mxu3 %v539_v14  ;;  %v572_v54 = vld [vmem:[%s1744_s6 + $0x730] sm:$0xff] }
  0x96   : > { %728 = vmatpush.msrb.mxu0 %v347_v16  ;;  %757 = vmatpush.msrb.mxu1 %v411_v17  ;;  %v380_v56 = vld [vmem:[%s1744_s6 + $0x130] sm:$0xff] }
  0x97   : > { %788 = vmatmul.f32.vlgmr.msrb.gmra.mxu2 %v1812_v62  ;;  %816 = vmatpush.msrb.mxu3 %v535_v18  ;;  %v444_v57 = vld [vmem:[%s1744_s6 + $0x330] sm:$0xff] }
  0x98   : > { %888 = vmatpush.msra.mxu2 %v532_v19  ;;  %729 = vmatpush.msrb.mxu0 %v343_v21  ;;  %v500_v58 = vld [vmem:[%s1744_s6 + $0x4f0] sm:$0xff] }
  0x99   : > { %758 = vmatpush.msrb.mxu1 %v407_v22  ;;  %817 = vmatmul.f32.vlgmr.msrb.gmra.mxu3 %v1814_v63  ;;  %v568_v59 = vld [vmem:[%s1744_s6 + $0x710] sm:$0xff] }
  0x9a   : > { %889 = vmatpush.msra.mxu2 %v528_v23  ;;  %917 = vmatpush.msra.mxu3 %v596_v24  ;;  %v376_v61 = vld [vmem:[%s1744_s6 + $0x110] sm:$0xff] }
  0x9b   : > { %730 = vmatmul.f32.vlgmr.msrb.gmra.mxu0 %v1823_v5  ;;  %759 = vmatmul.f32.vlgmr.msrb.gmra.mxu1 %v1825_v6  ;;  %v440_v0 = vld [vmem:[%s1744_s6 + $0x310] sm:$0xff] }
  0x9c   : > { %830 = vmatpush.msra.mxu0 %v404_v27  ;;  %859 = vmatpush.msra.mxu1 %v468_v28  ;;  %v496_v1 = vld [vmem:[%s1744_s6 + $0x4d0] sm:$0xff] }
  0x9d   : > { %890 = vmatpush.msra.mxu2 %v524_v29  ;;  %918 = vmatpush.msra.mxu3 %v592_v30  ;;  %v564_v2 = vld [vmem:[%s1744_s6 + $0x6f0] sm:$0xff] }
  0x9e   : > { %831 = vmatpush.msra.mxu0 %v400_v31  ;;  %860 = vmatpush.msra.mxu1 %v464_v32  ;;  %v372_v7 = vld [vmem:[%s1744_s6 + $0xf0] sm:$0xff] }
  0x9f   : > { %891 = vmatpush.msra.mxu2 %v520_v33  ;;  %919 = vmatpush.msra.mxu3 %v588_v34  ;;  %v436_v8 = vld [vmem:[%s1744_s6 + $0x2f0] sm:$0xff] }
  0xa0   : > { %791 = vmatmul.f32.gmra.mxu2 %v1837_v15  ;;  %832 = vmatpush.msra.mxu0 %v396_v36  ;;  %v492_v9 = vld [vmem:[%s1744_s6 + $0x4b0] sm:$0xff] }
  0xa1   : > { %861 = vmatpush.msra.mxu1 %v460_v37  ;;  %892 = vmatpush.msra.mxu2 %v516_v38  ;;  %v560_v10 = vld [vmem:[%s1744_s6 + $0x6d0] sm:$0xff] }
  0xa2   : > { %920 = vmatpush.msra.mxu3 %v584_v39  ;;  %833 = vmatpush.msra.mxu0 %v392_v41  ;;  %v368_v11 = vld [vmem:[%s1744_s6 + $0xd0] sm:$0xff]  ;;  %v533_v39 = vld [vmem:[%s1744_s6 + $0x5f8] sm:$0xff] }
  0xa3   : > { %820 = vmatmul.f32.gmra.mxu3 %v1844_v20  ;;  %862 = vmatpush.msra.mxu1 %v456_v42  ;;  %v432_v12 = vld [vmem:[%s1744_s6 + $0x2d0] sm:$0xff] }
  0xa4   : > { %893 = vmatpush.msra.mxu2 %v512_v43  ;;  %921 = vmatpush.msra.mxu3 %v580_v44  ;;  %v488_v13 = vld [vmem:[%s1744_s6 + $0x490] sm:$0xff]  ;;  %v529_v43 = vld [vmem:[%s1744_s6 + $0x5d8] sm:$0xff] }
  0xa5   : > { %733 = vmatmul.f32.gmra.mxu0 %v1850_v25  ;;  %762 = vmatmul.f32.gmra.mxu1 %v1853_v26  ;;  %v556_v14 = vld [vmem:[%s1744_s6 + $0x6b0] sm:$0xff]  ;;  %v597_v44 = vld [vmem:[%s1744_s6 + $0x7f8] sm:$0xff] }
  0xa6   : > { %834 = vmatpush.msra.mxu0 %v388_v47  ;;  %863 = vmatpush.msra.mxu1 %v452_v48  ;;  %v364_v16 = vld [vmem:[%s1744_s6 + $0xb0] sm:$0xff]  ;;  %v405_v47 = vld [vmem:[%s1744_s6 + $0x1f8] sm:$0xff] }
  0xa7   : > { %894 = vmatpush.msra.mxu2 %v508_v49  ;;  %922 = vmatpush.msra.mxu3 %v576_v50  ;;  %v428_v17 = vld [vmem:[%s1744_s6 + $0x2b0] sm:$0xff]  ;;  %v469_v48 = vld [vmem:[%s1744_s6 + $0x3f8] sm:$0xff] }
  0xa8   : > { %835 = vmatpush.msra.mxu0 %v384_v51  ;;  %864 = vmatpush.msra.mxu1 %v448_v52  ;;  %v484_v18 = vld [vmem:[%s1744_s6 + $0x470] sm:$0xff]  ;;  %v525_v49 = vld [vmem:[%s1744_s6 + $0x5b8] sm:$0xff] }
  0xa9   : > { %895 = vmatpush.msra.mxu2 %v504_v53  ;;  %923 = vmatpush.msra.mxu3 %v572_v54  ;;  %v552_v19 = vld [vmem:[%s1744_s6 + $0x690] sm:$0xff]  ;;  %v593_v50 = vld [vmem:[%s1744_s6 + $0x7d8] sm:$0xff] }
  0xaa   : > { %794 = vmatmul.f32.gmra.mxu2 %v1865_v35  ;;  %836 = vmatpush.msra.mxu0 %v380_v56  ;;  %v360_v21 = vld [vmem:[%s1744_s6 + $0x90] sm:$0xff]  ;;  %v401_v51 = vld [vmem:[%s1744_s6 + $0x1d8] sm:$0xff] }
  0xab   : > { %865 = vmatpush.msra.mxu1 %v444_v57  ;;  %896 = vmatpush.msra.mxu2 %v500_v58  ;;  %v424_v22 = vld [vmem:[%s1744_s6 + $0x290] sm:$0xff]  ;;  %v465_v52 = vld [vmem:[%s1744_s6 + $0x3d8] sm:$0xff] }
  0xac   : > { %924 = vmatpush.msra.mxu3 %v568_v59  ;;  %837 = vmatpush.msra.mxu0 %v376_v61  ;;  %v480_v23 = vld [vmem:[%s1744_s6 + $0x450] sm:$0xff]  ;;  %v521_v53 = vld [vmem:[%s1744_s6 + $0x598] sm:$0xff] }
  0xad   : > { %823 = vmatmul.f32.gmra.mxu3 %v1872_v40  ;;  %866 = vmatpush.msra.mxu1 %v440_v0  ;;  %v548_v24 = vld [vmem:[%s1744_s6 + $0x670] sm:$0xff]  ;;  %v589_v54 = vld [vmem:[%s1744_s6 + $0x7b8] sm:$0xff] }
  0xae   : > { %897 = vmatpush.msra.mxu2 %v496_v1  ;;  %925 = vmatpush.msra.mxu3 %v564_v2  ;;  %v356_v27 = vld [vmem:[%s1744_s6 + $0x70] sm:$0xff]  ;;  %v397_v56 = vld [vmem:[%s1744_s6 + $0x1b8] sm:$0xff] }
  0xaf   : > { %736 = vmatmul.f32.gmra.mxu0 %v1878_v45  ;;  %765 = vmatmul.f32.gmra.mxu1 %v1881_v46  ;;  %v420_v28 = vld [vmem:[%s1744_s6 + $0x270] sm:$0xff]  ;;  %v461_v57 = vld [vmem:[%s1744_s6 + $0x3b8] sm:$0xff] }
  0xb0   : > { %838 = vmatpush.msra.mxu0 %v372_v7  ;;  %867 = vmatpush.msra.mxu1 %v436_v8  ;;  %v476_v29 = vld [vmem:[%s1744_s6 + $0x430] sm:$0xff]  ;;  %v517_v58 = vld [vmem:[%s1744_s6 + $0x578] sm:$0xff] }
  0xb1   : > { %898 = vmatpush.msra.mxu2 %v492_v9  ;;  %926 = vmatpush.msra.mxu3 %v560_v10  ;;  %v544_v30 = vld [vmem:[%s1744_s6 + $0x650] sm:$0xff]  ;;  %v585_v59 = vld [vmem:[%s1744_s6 + $0x798] sm:$0xff] }
  0xb2   : > { %839 = vmatpush.msra.mxu0 %v368_v11  ;;  %868 = vmatpush.msra.mxu1 %v432_v12  ;;  %v352_v31 = vld [vmem:[%s1744_s6 + $0x50] sm:$0xff]  ;;  %v393_v61 = vld [vmem:[%s1744_s6 + $0x198] sm:$0xff] }
  0xb3   : > { %899 = vmatpush.msra.mxu2 %v488_v13  ;;  %927 = vmatpush.msra.mxu3 %v556_v14  ;;  %v416_v32 = vld [vmem:[%s1744_s6 + $0x250] sm:$0xff]  ;;  %v457_v0 = vld [vmem:[%s1744_s6 + $0x398] sm:$0xff] }
  0xb4   : > { %797 = vmatmul.f32.gmra.mxu2 %v1893_v55  ;;  %840 = vmatpush.msra.mxu0 %v364_v16  ;;  %v472_v33 = vld [vmem:[%s1744_s6 + $0x410] sm:$0xff]  ;;  %v513_v1 = vld [vmem:[%s1744_s6 + $0x558] sm:$0xff] }
  0xb5   : > { %869 = vmatpush.msra.mxu1 %v428_v17  ;;  %900 = vmatpush.msra.mxu2 %v484_v18  ;;  %v540_v34 = vld [vmem:[%s1744_s6 + $0x630] sm:$0xff]  ;;  %v581_v2 = vld [vmem:[%s1744_s6 + $0x778] sm:$0xff] }
  0xb6   : > { %928 = vmatpush.msra.mxu3 %v552_v19  ;;  %841 = vmatpush.msra.mxu0 %v360_v21  ;;  %v348_v36 = vld [vmem:[%s1744_s6 + $0x30] sm:$0xff]  ;;  %v389_v7 = vld [vmem:[%s1744_s6 + $0x178] sm:$0xff] }
  0xb7   : > { %826 = vmatmul.f32.gmra.mxu3 %v1900_v60  ;;  %870 = vmatpush.msra.mxu1 %v424_v22  ;;  %v412_v37 = vld [vmem:[%s1744_s6 + $0x230] sm:$0xff]  ;;  %v453_v8 = vld [vmem:[%s1744_s6 + $0x378] sm:$0xff] }
  0xb8   : > { %901 = vmatpush.msra.mxu2 %v480_v23  ;;  %929 = vmatpush.msra.mxu3 %v548_v24  ;;  %v536_v38 = vld [vmem:[%s1744_s6 + $0x610] sm:$0xff]  ;;  %v509_v9 = vld [vmem:[%s1744_s6 + $0x538] sm:$0xff] }
  0xb9   : > { %739 = vmatmul.f32.gmra.mxu0 %v1906_v3  ;;  %768 = vmatmul.f32.gmra.mxu1 %v1909_v4  ;;  %v344_v41 = vld [vmem:[%s1744_s6 + $0x10] sm:$0xff]  ;;  %v577_v10 = vld [vmem:[%s1744_s6 + $0x758] sm:$0xff] }
  0xba   : > { %842 = vmatpush.msra.mxu0 %v356_v27  ;;  %871 = vmatpush.msra.mxu1 %v420_v28  ;;  %v408_v42 = vld [vmem:[%s1744_s6 + $0x210] sm:$0xff]  ;;  %v385_v11 = vld [vmem:[%s1744_s6 + $0x158] sm:$0xff] }
  0xbb   : > { %902 = vmatpush.msra.mxu2 %v476_v29  ;;  %930 = vmatpush.msra.mxu3 %v544_v30  ;;  %v449_v12 = vld [vmem:[%s1744_s6 + $0x358] sm:$0xff] }
  0xbc   : > { %843 = vmatpush.msra.mxu0 %v352_v31  ;;  %872 = vmatpush.msra.mxu1 %v416_v32  ;;  %v505_v13 = vld [vmem:[%s1744_s6 + $0x518] sm:$0xff] }
  0xbd   : > { %903 = vmatpush.msra.mxu2 %v472_v33  ;;  %931 = vmatpush.msra.mxu3 %v540_v34  ;;  %v573_v14 = vld [vmem:[%s1744_s6 + $0x738] sm:$0xff] }
  0xbe   : > { %844 = vmatpush.msra.mxu0 %v348_v36  ;;  %873 = vmatpush.msra.mxu1 %v412_v37  ;;  %v381_v16 = vld [vmem:[%s1744_s6 + $0x138] sm:$0xff] }
  0xbf   : > { %904 = vmatmul.f32.vlgmr.msra.gmra.mxu2 %v1812_v62  ;;  %932 = vmatpush.msra.mxu3 %v536_v38  ;;  %v445_v17 = vld [vmem:[%s1744_s6 + $0x338] sm:$0xff] }
  0xc0   : > { %1004 = vmatpush.msrb.mxu2 %v533_v39  ;;  %845 = vmatpush.msra.mxu0 %v344_v41  ;;  %v501_v18 = vld [vmem:[%s1744_s6 + $0x4f8] sm:$0xff] }
  0xc1   : > { %874 = vmatpush.msra.mxu1 %v408_v42  ;;  %933 = vmatmul.f32.vlgmr.msra.gmra.mxu3 %v1814_v63  ;;  %v569_v19 = vld [vmem:[%s1744_s6 + $0x718] sm:$0xff] }
  0xc2   : > { %1005 = vmatpush.msrb.mxu2 %v529_v43  ;;  %1033 = vmatpush.msrb.mxu3 %v597_v44  ;;  %v377_v21 = vld [vmem:[%s1744_s6 + $0x118] sm:$0xff] }
  0xc3   : > { %846 = vmatmul.f32.vlgmr.msra.gmra.mxu0 %v1823_v5  ;;  %875 = vmatmul.f32.vlgmr.msra.gmra.mxu1 %v1825_v6  ;;  %v441_v22 = vld [vmem:[%s1744_s6 + $0x318] sm:$0xff] }
  0xc4   : > { %946 = vmatpush.msrb.mxu0 %v405_v47  ;;  %975 = vmatpush.msrb.mxu1 %v469_v48  ;;  %v497_v23 = vld [vmem:[%s1744_s6 + $0x4d8] sm:$0xff] }
  0xc5   : > { %1006 = vmatpush.msrb.mxu2 %v525_v49  ;;  %1034 = vmatpush.msrb.mxu3 %v593_v50  ;;  %v565_v24 = vld [vmem:[%s1744_s6 + $0x6f8] sm:$0xff] }
  0xc6   : > { %947 = vmatpush.msrb.mxu0 %v401_v51  ;;  %976 = vmatpush.msrb.mxu1 %v465_v52  ;;  %v373_v27 = vld [vmem:[%s1744_s6 + $0xf8] sm:$0xff] }
  0xc7   : > { %1007 = vmatpush.msrb.mxu2 %v521_v53  ;;  %1035 = vmatpush.msrb.mxu3 %v589_v54  ;;  %v437_v28 = vld [vmem:[%s1744_s6 + $0x2f8] sm:$0xff] }
  0xc8   : > { %907 = vmatmul.f32.gmra.mxu2 %v1837_v15  ;;  %948 = vmatpush.msrb.mxu0 %v397_v56  ;;  %v493_v29 = vld [vmem:[%s1744_s6 + $0x4b8] sm:$0xff] }
  0xc9   : > { %977 = vmatpush.msrb.mxu1 %v461_v57  ;;  %1008 = vmatpush.msrb.mxu2 %v517_v58  ;;  %v561_v30 = vld [vmem:[%s1744_s6 + $0x6d8] sm:$0xff] }
  0xca   : > { %1036 = vmatpush.msrb.mxu3 %v585_v59  ;;  %949 = vmatpush.msrb.mxu0 %v393_v61  ;;  %v369_v31 = vld [vmem:[%s1744_s6 + $0xd8] sm:$0xff] }
  0xcb   : > { %936 = vmatmul.f32.gmra.mxu3 %v1844_v20  ;;  %978 = vmatpush.msrb.mxu1 %v457_v0  ;;  %v433_v32 = vld [vmem:[%s1744_s6 + $0x2d8] sm:$0xff] }
  0xcc   : > { %1009 = vmatpush.msrb.mxu2 %v513_v1  ;;  %1037 = vmatpush.msrb.mxu3 %v581_v2  ;;  %v489_v33 = vld [vmem:[%s1744_s6 + $0x498] sm:$0xff]  ;;  %v2093_v2 = vld [vmem:[%s254_s10] sm:$0xf] }
  0xcd   : > { %849 = vmatmul.f32.gmra.mxu0 %v1850_v25  ;;  %878 = vmatmul.f32.gmra.mxu1 %v1853_v26  ;;  %v557_v34 = vld [vmem:[%s1744_s6 + $0x6b8] sm:$0xff] }
  0xce   : > { %950 = vmatpush.msrb.mxu0 %v389_v7  ;;  %979 = vmatpush.msrb.mxu1 %v453_v8  ;;  %v365_v36 = vld [vmem:[%s1744_s6 + $0xb8] sm:$0xff] }
  0xcf   : > { %1010 = vmatpush.msrb.mxu2 %v509_v9  ;;  %1038 = vmatpush.msrb.mxu3 %v577_v10  ;;  %v429_v37 = vld [vmem:[%s1744_s6 + $0x2b8] sm:$0xff] }
  0xd0   : > { %951 = vmatpush.msrb.mxu0 %v385_v11  ;;  %980 = vmatpush.msrb.mxu1 %v449_v12  ;;  %v485_v38 = vld [vmem:[%s1744_s6 + $0x478] sm:$0xff] }
  0xd1   : > { %1011 = vmatpush.msrb.mxu2 %v505_v13  ;;  %1039 = vmatpush.msrb.mxu3 %v573_v14  ;;  %v553_v39 = vld [vmem:[%s1744_s6 + $0x698] sm:$0xff] }
  0xd2   : > { %910 = vmatmul.f32.gmra.mxu2 %v1865_v35  ;;  %952 = vmatpush.msrb.mxu0 %v381_v16  ;;  %v361_v41 = vld [vmem:[%s1744_s6 + $0x98] sm:$0xff] }
  0xd3   : > { %981 = vmatpush.msrb.mxu1 %v445_v17  ;;  %1012 = vmatpush.msrb.mxu2 %v501_v18  ;;  %v425_v42 = vld [vmem:[%s1744_s6 + $0x298] sm:$0xff] }
  0xd4   : > { %1040 = vmatpush.msrb.mxu3 %v569_v19  ;;  %953 = vmatpush.msrb.mxu0 %v377_v21  ;;  %v481_v43 = vld [vmem:[%s1744_s6 + $0x458] sm:$0xff] }
  0xd5   : > { %939 = vmatmul.f32.gmra.mxu3 %v1872_v40  ;;  %982 = vmatpush.msrb.mxu1 %v441_v22  ;;  %v549_v44 = vld [vmem:[%s1744_s6 + $0x678] sm:$0xff] }
  0xd6   : > { %1013 = vmatpush.msrb.mxu2 %v497_v23  ;;  %1041 = vmatpush.msrb.mxu3 %v565_v24  ;;  %v357_v47 = vld [vmem:[%s1744_s6 + $0x78] sm:$0xff] }
  0xd7   : > { %852 = vmatmul.f32.gmra.mxu0 %v1878_v45  ;;  %881 = vmatmul.f32.gmra.mxu1 %v1881_v46  ;;  %v421_v48 = vld [vmem:[%s1744_s6 + $0x278] sm:$0xff] }
  0xd8   : > { %954 = vmatpush.msrb.mxu0 %v373_v27  ;;  %983 = vmatpush.msrb.mxu1 %v437_v28  ;;  %v477_v49 = vld [vmem:[%s1744_s6 + $0x438] sm:$0xff] }
  0xd9   : > { %1014 = vmatpush.msrb.mxu2 %v493_v29  ;;  %1042 = vmatpush.msrb.mxu3 %v561_v30  ;;  %v545_v50 = vld [vmem:[%s1744_s6 + $0x658] sm:$0xff] }
  0xda   : > { %955 = vmatpush.msrb.mxu0 %v369_v31  ;;  %984 = vmatpush.msrb.mxu1 %v433_v32  ;;  %v353_v51 = vld [vmem:[%s1744_s6 + $0x58] sm:$0xff]  ;;  %v1116_v31 = vperm.slane %v2093_v2, 1 }
  0xdb   : > { %1015 = vmatpush.msrb.mxu2 %v489_v33  ;;  %1043 = vmatpush.msrb.mxu3 %v557_v34  ;;  %v417_v52 = vld [vmem:[%s1744_s6 + $0x258] sm:$0xff] }
  0xdc   : > { %913 = vmatmul.f32.gmra.mxu2 %v1893_v55  ;;  %956 = vmatpush.msrb.mxu0 %v365_v36  ;;  %v473_v53 = vld [vmem:[%s1744_s6 + $0x418] sm:$0xff] }
  0xdd   : > { %985 = vmatpush.msrb.mxu1 %v429_v37  ;;  %1016 = vmatpush.msrb.mxu2 %v485_v38  ;;  %v541_v54 = vld [vmem:[%s1744_s6 + $0x638] sm:$0xff] }
  0xde   : > { %1044 = vmatpush.msrb.mxu3 %v553_v39  ;;  %957 = vmatpush.msrb.mxu0 %v361_v41  ;;  %v349_v56 = vld [vmem:[%s1744_s6 + $0x38] sm:$0xff] }
  0xdf   : > { %942 = vmatmul.f32.gmra.mxu3 %v1900_v60  ;;  %986 = vmatpush.msrb.mxu1 %v425_v42  ;;  %v413_v57 = vld [vmem:[%s1744_s6 + $0x238] sm:$0xff] }
  0xe0   : > { %1017 = vmatpush.msrb.mxu2 %v481_v43  ;;  %1045 = vmatpush.msrb.mxu3 %v549_v44  ;;  %v537_v58 = vld [vmem:[%s1744_s6 + $0x618] sm:$0xff] }
  0xe1   : > { %855 = vmatmul.f32.gmra.mxu0 %v1906_v3  ;;  %884 = vmatmul.f32.gmra.mxu1 %v1909_v4  ;;  %v345_v59 = vld [vmem:[%s1744_s6 + $0x18] sm:$0xff] }
  0xe2   : > { %958 = vmatpush.msrb.mxu0 %v357_v47  ;;  %987 = vmatpush.msrb.mxu1 %v421_v48  ;;  %v409_v61 = vld [vmem:[%s1744_s6 + $0x218] sm:$0xff] }
  0xe3   : > { %1018 = vmatpush.msrb.mxu2 %v477_v49  ;;  %1046 = vmatpush.msrb.mxu3 %v545_v50 }
  0xe4   : > { %959 = vmatpush.msrb.mxu0 %v353_v51  ;;  %988 = vmatpush.msrb.mxu1 %v417_v52 }
  0xe5   : > { %1019 = vmatpush.msrb.mxu2 %v473_v53  ;;  %1047 = vmatpush.msrb.mxu3 %v541_v54 }
  0xe6   : > { %960 = vmatpush.msrb.mxu0 %v349_v56  ;;  %989 = vmatpush.msrb.mxu1 %v413_v57 }
  0xe7   : > { %1020 = vmatmul.f32.vlgmr.msrb.gmra.mxu2 %v1812_v62  ;;  %1048 = vmatpush.msrb.mxu3 %v537_v58 }
  0xe8   : > { %961 = vmatpush.msrb.mxu0 %v345_v59  ;;  %990 = vmatpush.msrb.mxu1 %v409_v61 }
  0xe9   : > { %1049 = vmatmul.f32.vlgmr.msrb.gmra.mxu3 %v1814_v63  ;;  %962 = vmatmul.f32.vlgmr.msrb.gmra.mxu0 %v1823_v5 }
  0xea   : > { %991 = vmatmul.f32.vlgmr.msrb.gmra.mxu1 %v1825_v6  ;;  %v1115_v6 = vperm.slane %v2093_v2, 0 }
  0xef   : > { %1023 = vmatmul.f32.gmra.mxu2 %v1837_v15 }
  0xf0   : > { %v615_v0 = vpop.f32.mrf.mxu0  ;;  %v644_v1 = vpop.f32.mrf.mxu1 }
  0xf1   : > { %1052 = vmatmul.f32.gmra.mxu3 %v1844_v20  ;;  %965 = vmatmul.f32.gmra.mxu0 %v1850_v25  ;;  %v645_v62 = vadd.f32 %v644_v1, %v615_v0 }
  0xf2   : > { %994 = vmatmul.f32.gmra.mxu1 %v1853_v26  ;;  %v673_v63 = vpop.f32.mrf.mxu2 }
  0xf3   : > { %v702_v7 = vpop.f32.mrf.mxu3  ;;  %v674_v5 = vadd.f32 %v673_v63, %v645_v62 }
  0xf5   : > { %v703_v8 = vadd.f32 %v702_v7, %v674_v5 }
  0xf7   : > { %1026 = vmatmul.f32.gmra.mxu2 %v1865_v35  ;;  %v1123_v15 = vadd.f32 %v1115_v6, %v703_v8 }
  0xf9   : > { %1055 = vmatmul.f32.gmra.mxu3 %v1872_v40  ;;  %968 = vmatmul.f32.gmra.mxu0 %v1878_v45  ;;  %1139 = vst [vmem:[%s2103_s20] sm:$0xff] %v1123_v15  ;;  %v1117_v15 = vperm.slane %v2093_v2, 2 }
  0xfa   : > { %997 = vmatmul.f32.gmra.mxu1 %v1881_v46  ;;  %v618_v20 = vpop.f32.mrf.mxu0  ;;  %v647_v25 = vpop.f32.mrf.mxu1 }
  0xfb   : > { %v676_v26 = vpop.f32.mrf.mxu2  ;;  %v648_v9 = vadd.f32 %v647_v25, %v618_v20 }
  0xfd   : > { %v677_v10 = vadd.f32 %v676_v26, %v648_v9 }
  0xfe   : > { %v705_v11 = vpop.f32.mrf.mxu3 }
  0xff   : > { %1029 = vmatmul.f32.gmra.mxu2 %v1893_v55  ;;  %v706_v35 = vadd.f32 %v705_v11, %v677_v10 }
 0x101   : > { %1058 = vmatmul.f32.gmra.mxu3 %v1900_v60  ;;  %971 = vmatmul.f32.gmra.mxu0 %v1906_v3  ;;  %v1127_v40 = vadd.f32 %v1115_v6, %v706_v35 }
 0x102   : > { %1000 = vmatmul.f32.gmra.mxu1 %v1909_v4 }
 0x103   : > { %1143 = vst [vmem:[%s2103_s20 + $0x20] sm:$0xff] %v1127_v40 }
 0x104   : > { %v621_v45 = vpop.f32.mrf.mxu0  ;;  %v650_v46 = vpop.f32.mrf.mxu1 }
 0x105   : > { %v679_v12 = vpop.f32.mrf.mxu2  ;;  %v651_v13 = vadd.f32 %v650_v46, %v621_v45 }
 0x107   : > { %v680_v14 = vadd.f32 %v679_v12, %v651_v13 }
 0x108   : > { %v708_v16 = vpop.f32.mrf.mxu3 }
 0x109   : > { %v709_v17 = vadd.f32 %v708_v16, %v680_v14 }
 0x10b   : > { %v1131_v18 = vadd.f32 %v1115_v6, %v709_v17 }
 0x10d   : > { %1147 = vst [vmem:[%s2103_s20 + $0x40] sm:$0xff] %v1131_v18 }
 0x10e   : > { %v624_v55 = vpop.f32.mrf.mxu0  ;;  %v653_v19 = vpop.f32.mrf.mxu1 }
 0x10f   : > { %v682_v21 = vpop.f32.mrf.mxu2  ;;  %v654_v60 = vadd.f32 %v653_v19, %v624_v55 }
 0x111   : > { %v683_v3 = vadd.f32 %v682_v21, %v654_v60 }
 0x112   : > { %v711_v22 = vpop.f32.mrf.mxu3 }
 0x113   : > { %v712_v4 = vadd.f32 %v711_v22, %v683_v3 }
 0x115   : > { %v1135_v23 = vadd.f32 %v1115_v6, %v712_v4 }
 0x117   : > { %1151 = vst [vmem:[%s2103_s20 + $0x60] sm:$0xff] %v1135_v23 }
 0x118   : > { %v731_v24 = vpop.f32.mrf.mxu0  ;;  %v760_v27 = vpop.f32.mrf.mxu1 }
 0x119   : > { %v761_v28 = vadd.f32 %v760_v27, %v731_v24 }
 0x11a   : > { %v789_v29 = vpop.f32.mrf.mxu2 }
 0x11b   : > { %v790_v30 = vadd.f32 %v789_v29, %v761_v28 }
 0x11c   : > { %v818_v32 = vpop.f32.mrf.mxu3 }
 0x11d   : > { %v819_v33 = vadd.f32 %v818_v32, %v790_v30 }
 0x11f   : > { %v1124_v34 = vadd.f32 %v1116_v31, %v819_v33 }
 0x121   : > { %1140 = vst [vmem:[%s2103_s20 + $0x8] sm:$0xff] %v1124_v34  ;;  %v1118_v34 = vperm.slane %v2093_v2, 3 }
 0x122   : > { %v734_v36 = vpop.f32.mrf.mxu0  ;;  %v763_v37 = vpop.f32.mrf.mxu1 }
 0x123   : > { %v792_v38 = vpop.f32.mrf.mxu2  ;;  %v764_v39 = vadd.f32 %v763_v37, %v734_v36 }
 0x125   : > { %v793_v41 = vadd.f32 %v792_v38, %v764_v39 }
 0x126   : > { %v821_v42 = vpop.f32.mrf.mxu3 }
 0x127   : > { %v822_v43 = vadd.f32 %v821_v42, %v793_v41 }
 0x129   : > { %v1128_v44 = vadd.f32 %v1116_v31, %v822_v43 }
 0x12b   : > { %1144 = vst [vmem:[%s2103_s20 + $0x28] sm:$0xff] %v1128_v44 }
 0x12c   : > { %v737_v47 = vpop.f32.mrf.mxu0  ;;  %v766_v48 = vpop.f32.mrf.mxu1 }
 0x12d   : > { %v795_v49 = vpop.f32.mrf.mxu2  ;;  %v767_v50 = vadd.f32 %v766_v48, %v737_v47 }
 0x12f   : > { %v796_v51 = vadd.f32 %v795_v49, %v767_v50 }
 0x130   : > { %v824_v52 = vpop.f32.mrf.mxu3 }
 0x131   : > { %v825_v53 = vadd.f32 %v824_v52, %v796_v51 }
 0x133   : > { %v1132_v54 = vadd.f32 %v1116_v31, %v825_v53 }
 0x135   : > { %1148 = vst [vmem:[%s2103_s20 + $0x48] sm:$0xff] %v1132_v54 }
 0x136   : > { %v740_v56 = vpop.f32.mrf.mxu0  ;;  %v769_v57 = vpop.f32.mrf.mxu1 }
 0x137   : > { %v798_v58 = vpop.f32.mrf.mxu2  ;;  %v770_v59 = vadd.f32 %v769_v57, %v740_v56 }
 0x139   : > { %v799_v61 = vadd.f32 %v798_v58, %v770_v59 }
 0x13a   : > { %v827_v0 = vpop.f32.mrf.mxu3 }
 0x13b   : > { %v828_v1 = vadd.f32 %v827_v0, %v799_v61 }
 0x13d   : > { %v1136_v62 = vadd.f32 %v1116_v31, %v828_v1 }
 0x13f   : > { %1152 = vst [vmem:[%s2103_s20 + $0x68] sm:$0xff] %v1136_v62 }
 0x140   : > { %v847_v63 = vpop.f32.mrf.mxu0  ;;  %v876_v7 = vpop.f32.mrf.mxu1 }
 0x141   : > { %v877_v5 = vadd.f32 %v876_v7, %v847_v63 }
 0x142   : > { %v905_v6 = vpop.f32.mrf.mxu2 }
 0x143   : > { %v906_v8 = vadd.f32 %v905_v6, %v877_v5 }
 0x144   : > { %v934_v20 = vpop.f32.mrf.mxu3 }
 0x145   : > { %v935_v25 = vadd.f32 %v934_v20, %v906_v8 }
 0x147   : > { %v1125_v26 = vadd.f32 %v1117_v15, %v935_v25 }
 0x149   : > { %1141 = vst [vmem:[%s2103_s20 + $0x10] sm:$0xff] %v1125_v26 }
 0x14a   : > { %v850_v9 = vpop.f32.mrf.mxu0  ;;  %v879_v10 = vpop.f32.mrf.mxu1 }
 0x14b   : > { %v908_v11 = vpop.f32.mrf.mxu2  ;;  %v880_v35 = vadd.f32 %v879_v10, %v850_v9 }
 0x14d   : > { %v909_v40 = vadd.f32 %v908_v11, %v880_v35 }
 0x14e   : > { %v937_v45 = vpop.f32.mrf.mxu3 }
 0x14f   : > { %v938_v46 = vadd.f32 %v937_v45, %v909_v40 }
 0x151   : > { %v1129_v12 = vadd.f32 %v1117_v15, %v938_v46 }
 0x153   : > { %1145 = vst [vmem:[%s2103_s20 + $0x30] sm:$0xff] %v1129_v12 }
 0x154   : > { %v853_v13 = vpop.f32.mrf.mxu0  ;;  %v882_v14 = vpop.f32.mrf.mxu1 }
 0x155   : > { %v911_v16 = vpop.f32.mrf.mxu2  ;;  %v883_v17 = vadd.f32 %v882_v14, %v853_v13 }
 0x157   : > { %v912_v18 = vadd.f32 %v911_v16, %v883_v17 }
 0x158   : > { %v940_v55 = vpop.f32.mrf.mxu3 }
 0x159   : > { %v941_v19 = vadd.f32 %v940_v55, %v912_v18 }
 0x15b   : > { %v1133_v21 = vadd.f32 %v1117_v15, %v941_v19 }
 0x15d   : > { %1149 = vst [vmem:[%s2103_s20 + $0x50] sm:$0xff] %v1133_v21 }
 0x15e   : > { %v856_v60 = vpop.f32.mrf.mxu0  ;;  %v885_v3 = vpop.f32.mrf.mxu1 }
 0x15f   : > { %v914_v22 = vpop.f32.mrf.mxu2  ;;  %v886_v4 = vadd.f32 %v885_v3, %v856_v60 }
 0x161   : > { %v915_v23 = vadd.f32 %v914_v22, %v886_v4 }
 0x162   : > { %v943_v24 = vpop.f32.mrf.mxu3 }
 0x163   : > { %v944_v27 = vadd.f32 %v943_v24, %v915_v23 }
 0x165   : > { %v1137_v28 = vadd.f32 %v1117_v15, %v944_v27 }
 0x166   : > { %v963_v29 = vpop.f32.mrf.mxu0 }
 0x167   : > { %v992_v30 = vpop.f32.mrf.mxu1  ;;  %1153 = vst [vmem:[%s2103_s20 + $0x70] sm:$0xff] %v1137_v28 }
 0x168   : > { %v993_v31 = vadd.f32 %v992_v30, %v963_v29 }
 0x16a   : > { %v1021_v32 = vpop.f32.mrf.mxu2 }
 0x16b   : > { %v1022_v33 = vadd.f32 %v1021_v32, %v993_v31 }
 0x16c   : > { %v1050_v36 = vpop.f32.mrf.mxu3 }
 0x16d   : > { %v1051_v37 = vadd.f32 %v1050_v36, %v1022_v33 }
 0x16e   : > { %v966_v39 = vpop.f32.mrf.mxu0 }
 0x16f   : > { %v1126_v38 = vadd.f32 %v1118_v34, %v1051_v37  ;;  %v995_v41 = vpop.f32.mrf.mxu1 }
 0x170   : > { %v996_v42 = vadd.f32 %v995_v41, %v966_v39 }
 0x171   : > { %1142 = vst [vmem:[%s2103_s20 + $0x18] sm:$0xff] %v1126_v38 }
 0x172   : > { %v1024_v43 = vpop.f32.mrf.mxu2 }
 0x173   : > { %v1025_v44 = vadd.f32 %v1024_v43, %v996_v42 }
 0x174   : > { %v1053_v47 = vpop.f32.mrf.mxu3 }
 0x175   : > { %v1054_v48 = vadd.f32 %v1053_v47, %v1025_v44 }
 0x176   : > { %v969_v50 = vpop.f32.mrf.mxu0 }
 0x177   : > { %v1130_v49 = vadd.f32 %v1118_v34, %v1054_v48  ;;  %v998_v51 = vpop.f32.mrf.mxu1 }
 0x178   : > { %v999_v52 = vadd.f32 %v998_v51, %v969_v50 }
 0x179   : > { %1146 = vst [vmem:[%s2103_s20 + $0x38] sm:$0xff] %v1130_v49 }
 0x17a   : > { %v1027_v2 = vpop.f32.mrf.mxu2 }
 0x17b   : > { %v1028_v53 = vadd.f32 %v1027_v2, %v999_v52 }
 0x17c   : > { %v1056_v54 = vpop.f32.mrf.mxu3 }
 0x17d   : > { %v1057_v56 = vadd.f32 %v1056_v54, %v1028_v53 }
 0x17e   : > { %v972_v58 = vpop.f32.mrf.mxu0 }
 0x17f   : > { %v1134_v57 = vadd.f32 %v1118_v34, %v1057_v56  ;;  %v1001_v59 = vpop.f32.mrf.mxu1 }
 0x180   : > { %v1002_v61 = vadd.f32 %v1001_v59, %v972_v58 }
 0x181   : > { %1150 = vst [vmem:[%s2103_s20 + $0x58] sm:$0xff] %v1134_v57 }
 0x182   : > { %v1030_v0 = vpop.f32.mrf.mxu2 }
 0x183   : > { %v1031_v1 = vadd.f32 %v1030_v0, %v1002_v61 }
 0x184   : > { %v1059_v62 = vpop.f32.mrf.mxu3 }
 0x185   : > { %v1060_v63 = vadd.f32 %v1059_v62, %v1031_v1 }
 0x187   : > { %v1138_v7 = vadd.f32 %v1118_v34, %v1060_v63 }
 0x189   : > { %1154 = vst [vmem:[%s2103_s20 + $0x78] sm:$0xff] %v1138_v7 }
 0x18a   : > { %1524 = shalt.err (!%p1521_p11)
}
 0x18b   : > { %s1589_s9 = smov 512   ;;  %s1590_s6 = smov 1536  }
 0x18c   : > { %s1591_s7 = smov 32  }
 0x18d   : > { %1331 = dma.vmem_to_hbm [thread:$0]  (%p1701_p13), %s1172_s4, 2048, %s1174_s5, %s1156_s15, %s1589_s9, %s1590_s6, %s1591_s7  }
 0x18e PF: > { %p1351_p12 = scmp.ge.s32.totalorder %s1583_s17, 2  ;;  %s1188_s10 = sand.u32 1, %s1563_s12  }
 0x18f   : > { %s1189_s11 = scalar_lea.sflag [#allocation5], %s1188_s10 }
 0x190   : > { %p1345_p2 = pnand %p1351_p12, %p1705_p0 }
 0x192   : > { %p1346_p3 = pneg %p1345_p2 }
 0x194   : > { %1558 = dma.done.wait (%p1346_p3), %s1189_s11, 2048  }
 0x195   : > { %1560 = vsyncadd (%p1346_p3), %s1189_s11, 4294965248  ;;  %s20_s17 = sadd.s32 1, %s1583_s17   ;;  %s2184_s12 = smov %s1567_s13 }
 0x196   : > { %p17_p1 = scmp.ge.s32.totalorder %s20_s17, 5   ;;  %s2185_s13 = smov %s1571_s14 }
 0x197   : > { %s2186_s14 = smov %s1662_s24  ;;  %s2187_s15 = smov %s1579_s16 }
 0x198   : > { %s2188_s16 = smov %s2190_s18  ;;  %19 = sbr.rel (!%p17_p1) target bundleno = 10 (0xa), region = 102 }
 0x19d   :  { %1195 = vsyncpa [#allocation4], 1 }
 0x19e   :  { %1197 = vsyncpa [#allocation4 + $0x1], 1 }
 0x19f   :  { %1198 = vsyncpa [#allocation7], 1 }
 0x1a0   :  { %1200 = vsyncpa [#allocation7 + $0x1], 1 }
 0x1a1   :  { %1201 = vsyncpa [#allocation5], 1 }
 0x1a2   :  { %1203 = vsyncpa [#allocation5 + $0x1], 1 }

</bundles_post_ra>
